<compile_context>
chip_gen: v7x
topology: tpu7x:2x2x1
jax: 0.10.0
libtpu: 0.0.40
codegen_flags: <defaults>
</compile_context>

<pallas_src>
import functools

import jax
import jax.numpy as jnp
from jax import lax
from jax.experimental import pallas as pl
from jax.experimental.pallas import tpu as pltpu

IN_DIM = 200
HID_DIM = 100
OUT_DIM = 1
HID_PAD = 128   # 100 -> 128 lanes (weights only; tiny, grid-invariant arrays)
LANE = 128


def _round_up(n, m):
    return (n + m - 1) // m * m


def blended_kernel(x_ref, w1_ref, b1_ref, w2_ref, b2_ref, o_ref, *, precision):
    # Layer 1 on the MXU: (bm, 200) @ (200, 128) -> (bm, 128), f32 accumulate.
    h = jnp.dot(
        x_ref[...], w1_ref[...],
        preferred_element_type=jnp.float32,
        precision=precision,
    )
    h = h + b1_ref[...]                       # (1, 128) broadcast (padded lanes stay 0)
    h = jnp.where(h > 0, h, 0.01 * h)         # leaky_relu, slope 0.01 (VPU)

    # Layer 2 has N=1: VPU multiply + XLU lane reduction instead of a 1-wide matmul.
    o = jnp.sum(h * w2_ref[...], axis=-1, keepdims=True) + b2_ref[...]   # (bm, 1)

    # Lane-dense store: (bm, 1) -> (1, bm) so the vst is wide and unmasked.
    o_ref[...] = jnp.transpose(o).astype(o_ref.dtype)


def blended_component(x, w1, b1, w2, b2, *, bm=1024,
                      precision=lax.Precision.HIGHEST):
    """Forward pass of Blended_Component.

    x : (B, 200) float32
    w1: (200, 100) float32   (transposed vs. PyTorch fc1.weight)
    b1: (100,)     float32
    w2: (100, 1)   float32   (transposed vs. PyTorch fc2.weight)
    b2: (1,)       float32
    returns (B, 1) float32
    """
    B, in_dim = x.shape
    assert in_dim == IN_DIM, f"expected {IN_DIM} input features, got {in_dim}"

    # Batch tiling.  bm_eff is a multiple of 128 (keeps the lane-dense (1, bm)
    # output block legal).  For B >= 128 no copy of x is made: the last grid
    # step simply reads a partial block.  Only tiny batches (< 128) get padded.
    if B < LANE:
        bm_eff = LANE
        x_in = jnp.pad(x, ((0, LANE - B), (0, 0)))
        B_in = LANE
    else:
        bm_eff = min(_round_up(bm, LANE), (B // LANE) * LANE)
        x_in = x
        B_in = B
    grid_n = pl.cdiv(B_in, bm_eff)
    B_out = grid_n * bm_eff

    # Pad only the tiny, grid-invariant weight arrays in the hidden dim.
    w1_p = jnp.pad(w1, ((0, 0), (0, HID_PAD - HID_DIM)))                      # (200, 128)
    b1_p = jnp.pad(jnp.reshape(b1, (1, HID_DIM)), ((0, 0), (0, HID_PAD - HID_DIM)))
    w2_p = jnp.pad(jnp.reshape(w2, (1, HID_DIM)), ((0, 0), (0, HID_PAD - HID_DIM)))
    b2_p = jnp.reshape(b2, (1, 1))

    kernel = functools.partial(blended_kernel, precision=precision)

    out = pl.pallas_call(
        kernel,
        out_shape=jax.ShapeDtypeStruct((1, B_out), x.dtype),
        grid_spec=pltpu.PrefetchScalarGridSpec(
            num_scalar_prefetch=0,
            grid=(grid_n,),
            in_specs=[
                pl.BlockSpec((bm_eff, IN_DIM), lambda i: (i, 0)),    # x tile (full K)
                pl.BlockSpec((IN_DIM, HID_PAD), lambda i: (0, 0)),   # w1 (grid-invariant)
                pl.BlockSpec((1, HID_PAD), lambda i: (0, 0)),        # b1
                pl.BlockSpec((1, HID_PAD), lambda i: (0, 0)),        # w2 row
                pl.BlockSpec((1, 1), lambda i: (0, 0)),              # b2
            ],
            out_specs=pl.BlockSpec((1, bm_eff), lambda i: (0, i)),   # lane-dense
        ),
        compiler_params=pltpu.CompilerParams(
            dimension_semantics=("parallel",)),
    )(x_in, w1_p, b1_p, w2_p, b2_p)

    return out[0, :B].reshape(B, OUT_DIM)


def init_params(key):
    # Deterministic synthetic init mimicking nn.Linear's uniform(-1/sqrt(fan_in), +).
    k1, k2, k3, k4 = jax.random.split(key, 4)
    bound1 = 1.0 / jnp.sqrt(IN_DIM)
    bound2 = 1.0 / jnp.sqrt(HID_DIM)
    w1 = jax.random.uniform(k1, (IN_DIM, HID_DIM), jnp.float32, -bound1, bound1)
    b1 = jax.random.uniform(k2, (HID_DIM,), jnp.float32, -bound1, bound1)
    w2 = jax.random.uniform(k3, (HID_DIM, OUT_DIM), jnp.float32, -bound2, bound2)
    b2 = jax.random.uniform(k4, (OUT_DIM,), jnp.float32, -bound2, bound2)
    return w1, b1, w2, b2


def _reference(x, w1, b1, w2, b2):
    h = jnp.dot(x, w1, precision=lax.Precision.HIGHEST) + b1.reshape(1, -1)
    h = jnp.where(h > 0, h, 0.01 * h)
    return jnp.dot(h, w2, precision=lax.Precision.HIGHEST) + b2.reshape(1, -1)


if __name__ == "__main__":
    key = jax.random.PRNGKey(0)
    kx, kx2, kx3, kp = jax.random.split(key, 4)
    w1, b1, w2, b2 = init_params(kp)

    # Small batch (< 128): exercises the tiny-batch pad path.
    B = 16
    x = jax.random.normal(kx, (B, IN_DIM), jnp.float32)
    out = jax.block_until_ready(blended_component(x, w1, b1, w2, b2))
    ref = _reference(x, w1, b1, w2, b2)
    assert out.shape == (B, OUT_DIM)
    assert jnp.allclose(out, ref, atol=1e-5, rtol=1e-5), "small-batch mismatch"

    # Ragged batch, multi-step grid with a partial last block (no x copy).
    B2 = 300
    x2 = jax.random.normal(kx2, (B2, IN_DIM), jnp.float32)
    out2 = jax.block_until_ready(blended_component(x2, w1, b1, w2, b2, bm=128))
    ref2 = _reference(x2, w1, b1, w2, b2)
    assert out2.shape == (B2, OUT_DIM)
    assert jnp.allclose(out2, ref2, atol=1e-5, rtol=1e-5), "partial-block mismatch"

    # Divisible batch, multi-step grid (clean full-block path).
    B3 = 256
    x3 = jax.random.normal(kx3, (B3, IN_DIM), jnp.float32)
    out3 = jax.block_until_ready(blended_component(x3, w1, b1, w2, b2, bm=128))
    ref3 = _reference(x3, w1, b1, w2, b2)
    assert out3.shape == (B3, OUT_DIM)
    assert jnp.allclose(out3, ref3, atol=1e-5, rtol=1e-5), "full-block mismatch"

    print("KERNEL_OK")
</pallas_src>

<mosaic_0001>
module attributes {stable_mosaic.version = 11 : i64} {
  func.func @blended_kernel(%arg0: i32, %arg1: memref<128x200xf32, #tpu.memory_space<vmem>>, %arg2: memref<200x128xf32, #tpu.memory_space<vmem>>, %arg3: memref<1x128xf32, #tpu.memory_space<vmem>>, %arg4: memref<1x128xf32, #tpu.memory_space<vmem>>, %arg5: memref<1x1xf32, #tpu.memory_space<vmem>>, %arg6: memref<1x128xf32, #tpu.memory_space<vmem>>) attributes {dimension_semantics = [#tpu.dimension_semantics<parallel>], iteration_bounds = array<i64: 1>, scalar_prefetch = 0 : i64, scratch_operands = 0 : i64, tpu.core_type = #tpu.core_type<tc>, window_params = [{transform_indices = @transform_0, window_bounds = array<i64: 128, 200>}, {pipeline_mode = #tpu.pipeline_mode<synchronous>, transform_indices = @transform_1, window_bounds = array<i64: 200, 128>}, {pipeline_mode = #tpu.pipeline_mode<synchronous>, transform_indices = @transform_2, window_bounds = array<i64: 1, 128>}, {pipeline_mode = #tpu.pipeline_mode<synchronous>, transform_indices = @transform_3, window_bounds = array<i64: 1, 128>}, {pipeline_mode = #tpu.pipeline_mode<synchronous>, transform_indices = @transform_4, window_bounds = array<i64: 1, 1>}, {transform_indices = @transform_5, window_bounds = array<i64: 1, 128>}]} {
    %c0 = arith.constant 0 : index
    %c0_0 = arith.constant 0 : index
    %0 = vector.load %arg1[%c0, %c0_0] : memref<128x200xf32, #tpu.memory_space<vmem>>, vector<128x200xf32>
    %c0_1 = arith.constant 0 : index
    %c0_2 = arith.constant 0 : index
    %1 = vector.load %arg2[%c0_1, %c0_2] : memref<200x128xf32, #tpu.memory_space<vmem>>, vector<200x128xf32>
    %cst = arith.constant dense<0.000000e+00> : vector<128x128xf32>
    %2 = tpu.matmul %0, %1, %cst {dimension_numbers = #tpu.dot_dimension_numbers<[1], [0], [0], [1], [0, 0, 1, 1], [], []>, precision = #tpu.contract_precision<fp32>} : vector<128x200xf32>, vector<200x128xf32>, vector<128x128xf32> -> vector<128x128xf32>
    %c0_3 = arith.constant 0 : index
    %c0_4 = arith.constant 0 : index
    %3 = vector.load %arg3[%c0_3, %c0_4] : memref<1x128xf32, #tpu.memory_space<vmem>>, vector<1x128xf32>
    %4 = vector.broadcast %3 : vector<1x128xf32> to vector<128x128xf32>
    %5 = arith.addf %2, %4 : vector<128x128xf32>
    %cst_5 = arith.constant 0.000000e+00 : f32
    %6 = vector.broadcast %cst_5 : f32 to vector<128x128xf32>
    %7 = arith.cmpf ogt, %5, %6 : vector<128x128xf32>
    %cst_6 = arith.constant 0.00999999977 : f32
    %8 = vector.broadcast %cst_6 : f32 to vector<128x128xf32>
    %9 = arith.mulf %8, %5 : vector<128x128xf32>
    %10 = arith.select %7, %5, %9 : vector<128x128xi1>, vector<128x128xf32>
    %c0_7 = arith.constant 0 : index
    %c0_8 = arith.constant 0 : index
    %11 = vector.load %arg4[%c0_7, %c0_8] : memref<1x128xf32, #tpu.memory_space<vmem>>, vector<1x128xf32>
    %12 = vector.broadcast %11 : vector<1x128xf32> to vector<128x128xf32>
    %13 = arith.mulf %10, %12 : vector<128x128xf32>
    %cst_9 = arith.constant dense<0.000000e+00> : vector<128xf32>
    %14 = vector.multi_reduction <add>, %13, %cst_9 [1] : vector<128x128xf32> to vector<128xf32>
    %15 = vector.shape_cast %14 : vector<128xf32> to vector<128x1xf32>
    %c0_10 = arith.constant 0 : index
    %c0_11 = arith.constant 0 : index
    %16 = vector.load %arg5[%c0_10, %c0_11] : memref<1x1xf32, #tpu.memory_space<vmem>>, vector<1x1xf32>
    %17 = vector.broadcast %16 : vector<1x1xf32> to vector<128x1xf32>
    %18 = arith.addf %15, %17 : vector<128x1xf32>
    %19 = tpu.transpose %18, [1, 0] : vector<128x1xf32> -> vector<1x128xf32>
    %c0_12 = arith.constant 0 : index
    %c0_13 = arith.constant 0 : index
    %20 = vector.load %arg6[%c0_12, %c0_13] : memref<1x128xf32, #tpu.memory_space<vmem>>, vector<1x128xf32>
    tpu.vector_store %arg6[%c0_12, %c0_13], %19 {strides = array<i32>} : memref<1x128xf32, #tpu.memory_space<vmem>>, vector<1x128xf32>,
    return
  }
  func.func @transform_0(%arg0: i32) -> (i32, i32) {
    %c0_i32 = arith.constant 0 : i32
    %c0_i32_0 = arith.constant 0 : i32
    return %arg0, %c0_i32 : i32, i32
  }
  func.func @transform_1(%arg0: i32) -> (i32, i32) {
    %c0_i32 = arith.constant 0 : i32
    %c0_i32_0 = arith.constant 0 : i32
    %c0_i32_1 = arith.constant 0 : i32
    return %c0_i32, %c0_i32_0 : i32, i32
  }
  func.func @transform_2(%arg0: i32) -> (i32, i32) {
    %c0_i32 = arith.constant 0 : i32
    %c0_i32_0 = arith.constant 0 : i32
    %c0_i32_1 = arith.constant 0 : i32
    return %c0_i32, %c0_i32_0 : i32, i32
  }
  func.func @transform_3(%arg0: i32) -> (i32, i32) {
    %c0_i32 = arith.constant 0 : i32
    %c0_i32_0 = arith.constant 0 : i32
    %c0_i32_1 = arith.constant 0 : i32
    return %c0_i32, %c0_i32_0 : i32, i32
  }
  func.func @transform_4(%arg0: i32) -> (i32, i32) {
    %c0_i32 = arith.constant 0 : i32
    %c0_i32_0 = arith.constant 0 : i32
    %c0_i32_1 = arith.constant 0 : i32
    return %c0_i32, %c0_i32_0 : i32, i32
  }
  func.func @transform_5(%arg0: i32) -> (i32, i32) {
    %c0_i32 = arith.constant 0 : i32
    %c0_i32_0 = arith.constant 0 : i32
    return %c0_i32, %arg0 : i32, i32
  }
}

</mosaic_0001>

<bundles_post_ra>
// kernel: tpu_custom_call.1
= control target key start
LH: loop header
LB: loop body
LE: loop exit
PB: predicated region body
PF: predicated region fallthrough
CT: control target
= control target key end

     0   :  { %s3528_s0 = inlined_call_operand.vmem [shape: f32[128,200], index: 0, kind: input, shape index: {}]   ;;  %s3529_s1 = inlined_call_operand.vmem [shape: f32[200,128], index: 1, kind: input, shape index: {}]   ;;  %s3530_s2 = inlined_call_operand.vmem [shape: f32[1,128], index: 2, kind: input, shape index: {}]   ;;  %s3531_s3 = inlined_call_operand.vmem [shape: f32[1,128], index: 3, kind: input, shape index: {}]   ;;  %s3532_s4 = inlined_call_operand.<no memory space> [shape: f32[1,1], index: 4, kind: input, shape index: {}]   ;;  %s3533_s5 = inlined_call_operand.hbm [shape: f32[1,128], index: 5, kind: output, shape index: {}]  }
   0x1   :  { %v10_v0 = vstv %s3532_s4 }
   0x2   :  { %11 = vst [vmem:[#allocation2] sm:$0x1] %v10_v0 }
   0x3   :  { %v55_v1 = vld [vmem:[%s3529_s1] sm:$0xff]  ;;  %v56_v2 = vld [vmem:[%s3529_s1 + $0x8] sm:$0xff]  ;;  %v57_v3 = vld [vmem:[%s3529_s1 + $0x10] sm:$0xff]  ;;  %v3534_v4 = vmov 0.0|0.0   ;;  %vm87_vm0 = vcmask 588800  }
   0x4   :  { %1923 = vmatprep.subr.bf16.mxu1 %v3534_v4  ;;  %2031 = vmatprep.subr.bf16.mxu0 %v3534_v4  ;;  %v137_v5 = vand.u32 4294901760, %v55_v1  ;;  %v140_v6 = vand.u32 4294901760, %v56_v2  ;;  %v58_v7 = vld [vmem:[%s3529_s1 + $0x18] sm:$0xff]  ;;  %v143_v8 = vand.u32 4294901760, %v57_v3  ;;  %v59_v10 = vld [vmem:[%s3529_s1 + $0x20] sm:$0xff]  ;;  %v60_v11 = vld [vmem:[%s3529_s1 + $0x28] sm:$0xff] }
   0x5   :  { %v146_v9 = vand.u32 4294901760, %v58_v7  ;;  %v149_v14 = vand.u32 4294901760, %v59_v10  ;;  %v152_v15 = vand.u32 4294901760, %v60_v11  ;;  %v61_v16 = vld [vmem:[%s3529_s1 + $0x30] sm:$0xff]  ;;  %v62_v17 = vld [vmem:[%s3529_s1 + $0x38] sm:$0xff]  ;;  %v63_v21 = vld [vmem:[%s3529_s1 + $0x40] sm:$0xff] }
   0x6   :  { %v2382_v12 = vpack.c.bf16 %v140_v6, %v137_v5  ;;  %v155_v19 = vand.u32 4294901760, %v61_v16  ;;  %v158_v20 = vand.u32 4294901760, %v62_v17  ;;  %v64_v22 = vld [vmem:[%s3529_s1 + $0x48] sm:$0xff]  ;;  %v161_v25 = vand.u32 4294901760, %v63_v21  ;;  %v65_v27 = vld [vmem:[%s3529_s1 + $0x50] sm:$0xff]  ;;  %v66_v28 = vld [vmem:[%s3529_s1 + $0x58] sm:$0xff] }
   0x7   :  { %v2386_v13 = vpack.c.bf16 %v146_v9, %v143_v8  ;;  %v2398_v18 = vpack.c.bf16 %v152_v15, %v149_v14  ;;  %v24_v23 = vld [vmem:[%s3528_s0 + $0x8] sm:$0xff]  ;;  %v164_v26 = vand.u32 4294901760, %v64_v22  ;;  %v2424_v30 = vsub.f32 %v55_v1, %v137_v5  ;;  %v67_v31 = vld [vmem:[%s3529_s1 + $0x60] sm:$0xff]  ;;  %v69_v40 = vld [vmem:[%s3529_s1 + $0x70] sm:$0xff] }
   0x8   :  { %3639 = vst [vmem:[#allocation6_spill] sm:$0xff] %v2382_v12  ;;  %1925 = vmatpush1.bf16.msra.mxu1 %v2382_v12  ;;  %2033 = vmatpush1.bf16.msra.mxu0 %v2382_v12  ;;  %v2413_v24 = vpack.c.bf16 %v158_v20, %v155_v19  ;;  %v89_v29 = vsel %vm87_vm0, %v24_v23, 0  ;;  %v167_v33 = vand.u32 4294901760, %v65_v27  ;;  %v170_v34 = vand.u32 4294901760, %v66_v28  ;;  %v68_v35 = vld [vmem:[%s3529_s1 + $0x68] sm:$0xff]  ;;  %v70_v41 = vld [vmem:[%s3529_s1 + $0x78] sm:$0xff] }
   0x9   :  { %3640 = vst [vmem:[#allocation7_spill] sm:$0xff] %v2386_v13  ;;  %1926 = vmatprep.subr.bf16.mxu1 %v3534_v4  ;;  %2034 = vmatprep.subr.bf16.mxu0 %v3534_v4  ;;  %3641 = vst [vmem:[#allocation8_spill] sm:$0xff] %v2398_v18  ;;  %v2431_v32 = vpack.c.bf16 %v164_v26, %v161_v25  ;;  %v2436_v36 = vand.u32 4294901760, %v89_v29  ;;  %v2438_v37 = vsub.f32 %v56_v2, %v140_v6  ;;  %v71_v45 = vld [vmem:[%s3529_s1 + $0x80] sm:$0xff]  ;;  %v72_v46 = vld [vmem:[%s3529_s1 + $0x88] sm:$0xff] }
   0xa   :  { %3642 = vst [vmem:[#allocation9_spill] sm:$0xff] %v2413_v24  ;;  %3643 = vst [vmem:[#allocation10_spill] sm:$0xff] %v2424_v30  ;;  %v2440_v38 = vsub.f32 %v57_v3, %v143_v8  ;;  %v2442_v39 = vsub.f32 %v58_v7, %v146_v9  ;;  %v2452_v42 = vsub.f32 %v59_v10, %v149_v14  ;;  %v173_v44 = vand.u32 4294901760, %v67_v31  ;;  %v23_v48 = vld [vmem:[%s3528_s0] sm:$0xff] }
   0xb   :  { %3644 = vst [vmem:[#allocation11_spill] sm:$0xff] %v2431_v32  ;;  %3645 = vst [vmem:[#allocation12_spill] sm:$0xff] %v2436_v36  ;;  %v2454_v43 = vsub.f32 %v60_v11, %v152_v15  ;;  %v2463_v47 = vsub.f32 %v89_v29, %v2436_v36  ;;  %v2468_v49 = vsub.f32 %v61_v16, %v155_v19  ;;  %v176_v52 = vand.u32 4294901760, %v68_v35 }
   0xc   :  { %1928 = vmatpush1.bf16.msra.mxu1 %v2386_v13  ;;  %2036 = vmatpush1.bf16.msra.mxu0 %v2386_v13  ;;  %3646 = vst [vmem:[#allocation13_spill] sm:$0xff] %v2438_v37  ;;  %3647 = vst [vmem:[#allocation14_spill] sm:$0xff] %v2440_v38  ;;  %v2470_v50 = vsub.f32 %v62_v17, %v158_v20  ;;  %v2472_v51 = vsub.f32 %v63_v21, %v161_v25 }
   0xd   :  { %1929 = vmatprep.subr.bf16.mxu1 %v3534_v4  ;;  %2037 = vmatprep.subr.bf16.mxu0 %v3534_v4  ;;  %3648 = vst [vmem:[#allocation15_spill] sm:$0xff] %v2442_v39  ;;  %3649 = vst [vmem:[#allocation16_spill] sm:$0xff] %v2452_v42 }
   0xe   :  { %3650 = vst [vmem:[#allocation17_spill] sm:$0xff] %v2454_v43  ;;  %3651 = vst [vmem:[#allocation18_spill] sm:$0xff] %v2463_v47 }
   0xf   :  { %3652 = vst [vmem:[#allocation19_spill] sm:$0xff] %v2468_v49  ;;  %3653 = vst [vmem:[#allocation20_spill] sm:$0xff] %v2470_v50 }
  0x10   :  { %1931 = vmatpush1.bf16.msra.mxu1 %v2398_v18  ;;  %2039 = vmatpush1.bf16.msra.mxu0 %v2398_v18 }
  0x11   :  { %1932 = vmatprep.subr.bf16.mxu1 %v3534_v4  ;;  %2040 = vmatprep.subr.bf16.mxu0 %v3534_v4 }
  0x14   :  { %1934 = vmatpush1.bf16.msra.mxu1 %v2413_v24  ;;  %2042 = vmatpush1.bf16.msra.mxu0 %v2413_v24 }
  0x15   :  { %1935 = vmatprep.subr.bf16.mxu1 %v3534_v4  ;;  %2043 = vmatprep.subr.bf16.mxu0 %v3534_v4 }
  0x16   :  { %12 = vsyncpa [#allocation4], 0  ;;  %v2476_v53 = vpack.c.bf16 %v170_v34, %v167_v33  ;;  %v179_v54 = vand.u32 4294901760, %v69_v40  ;;  %v182_v55 = vand.u32 4294901760, %v70_v41  ;;  %v73_v56 = vld [vmem:[%s3529_s1 + $0x90] sm:$0xff]  ;;  %v74_v57 = vld [vmem:[%s3529_s1 + $0x98] sm:$0xff]  ;;  %v2485_v59 = vsub.f32 %v64_v22, %v164_v26 }
  0x17   :  { %v227_v58 = vand.u32 4294901760, %v2463_v47  ;;  %v185_v60 = vand.u32 4294901760, %v71_v45  ;;  %v188_v61 = vand.u32 4294901760, %v72_v46  ;;  %v2489_v62 = vand.u32 4294901760, %v23_v48  ;;  %v26_v63 = vld [vmem:[%s3528_s0 + $0x18] sm:$0xff]  ;;  %v25_v5 = vld [vmem:[%s3528_s0 + $0x10] sm:$0xff] }
  0x18   :  { %1937 = vmatpush1.bf16.msra.mxu1 %v2431_v32  ;;  %2045 = vmatpush1.bf16.msra.mxu0 %v2431_v32  ;;  %3654 = vst [vmem:[#allocation21_spill] sm:$0xff] %v2476_v53  ;;  %v2494_v0 = vsub.f32 %v65_v27, %v167_v33  ;;  %v2496_v1 = vsub.f32 %v66_v28, %v170_v34  ;;  %v191_v8 = vand.u32 4294901760, %v73_v56  ;;  %v194_v9 = vand.u32 4294901760, %v74_v57  ;;  %v75_v10 = vld [vmem:[%s3529_s1 + $0xa0] sm:$0xff]  ;;  %v76_v11 = vld [vmem:[%s3529_s1 + $0xa8] sm:$0xff]  ;;  %v77_v21 = vld [vmem:[%s3529_s1 + $0xb0] sm:$0xff] }
  0x19   :  { %1938 = vmatprep.subr.bf16.mxu1 %v3534_v4  ;;  %2046 = vmatprep.subr.bf16.mxu0 %v3534_v4  ;;  %3655 = vst [vmem:[#allocation22_spill] sm:$0xff] %v2489_v62  ;;  %v2498_v2 = vsub.f32 %v67_v31, %v173_v44  ;;  %v228_v3 = vsub.f32 %v2463_v47, %v227_v58  ;;  %v92_v17 = vsel %vm87_vm0, %v26_v63, 0  ;;  %v78_v22 = vld [vmem:[%s3529_s1 + $0xb8] sm:$0xff]  ;;  %v2536_v25 = vand.u32 4294901760, %v25_v5  ;;  %v28_v26 = vld [vmem:[%s3528_s0 + $0x28] sm:$0xff] }
  0x1a   :  { %3656 = vst [vmem:[#allocation23_spill] sm:$0xff] %v2496_v1  ;;  %1119 = vmatprep.mubr.f32.mxu0 %v227_v58  ;;  %v2504_v6 = vpack.c.bf16 %v176_v52, %v173_v44  ;;  %v2506_v7 = vsub.f32 %v68_v35, %v176_v52  ;;  %v2516_v14 = vpack.c.bf16 %v182_v55, %v179_v54  ;;  %v197_v28 = vand.u32 4294901760, %v75_v10  ;;  %v79_v35 = vld [vmem:[%s3529_s1 + $0xc0] sm:$0xff]  ;;  %v30_v52 = vld [vmem:[%s3528_s0 + $0x38] sm:$0xff] }
  0x1b   :  { %v2518_v15 = vsub.f32 %v69_v40, %v179_v54  ;;  %v229_v16 = vand.u32 4294901760, %v228_v3  ;;  %v2523_v19 = vsub.f32 %v70_v41, %v182_v55  ;;  %v2525_v20 = vpack.c.bf16 %v188_v61, %v185_v60  ;;  %3661 = vst [vmem:[#allocation28_spill] sm:$0xff] %v2536_v25 }
  0x1c   :  { %3657 = vst [vmem:[#allocation24_spill] sm:$0xff] %v2504_v6  ;;  %1940 = vmatpush1.bf16.msra.mxu1 %v2476_v53  ;;  %2048 = vmatpush1.bf16.msra.mxu0 %v2476_v53  ;;  %3658 = vst [vmem:[#allocation25_spill] sm:$0xff] %v2516_v14  ;;  %v2534_v23 = vsub.f32 %v23_v48, %v2489_v62  ;;  %v2541_v27 = vsub.f32 %v71_v45, %v185_v60  ;;  %v200_v29 = vand.u32 4294901760, %v76_v11  ;;  %v27_v60 = vld [vmem:[%s3528_s0 + $0x20] sm:$0xff]  ;;  %v3671_v47 = vmov 0.0|0.0  }
  0x1d   :  { %1941 = vmatprep.subr.bf16.mxu1 %v3534_v4  ;;  %2049 = vmatprep.subr.bf16.mxu0 %v3534_v4  ;;  %3659 = vst [vmem:[#allocation26_spill] sm:$0xff] %v2525_v20  ;;  %v469_v31 = vand.u32 4294901760, %v2424_v30  ;;  %v2544_v33 = vsub.f32 %v72_v46, %v188_v61  ;;  %v2546_v34 = vpack.c.bf16 %v194_v9, %v191_v8  ;;  %v476_v40 = vand.u32 4294901760, %v2438_v37 }
  0x1e   :  { %3660 = vst [vmem:[#allocation27_spill] sm:$0xff] %v2534_v23  ;;  %230 = vmatprep.mubr.f32.mxu1 %v229_v16  ;;  %v2552_v41 = vand.u32 4294901760, %v92_v17  ;;  %v2556_v44 = vsub.f32 %v73_v56, %v191_v8  ;;  %v203_v45 = vand.u32 4294901760, %v77_v21  ;;  %v206_v48 = vand.u32 4294901760, %v78_v22  ;;  %v32_v8 = vld [vmem:[%s3528_s0 + $0x48] sm:$0xff] }
  0x1f   :  { %3662 = vst [vmem:[#allocation29_spill] sm:$0xff] %v2546_v34  ;;  %v95_v46 = vsel %vm87_vm0, %v28_v26, 0  ;;  %v2564_v54 = vsub.f32 %v74_v57, %v194_v9  ;;  %v2566_v55 = vsub.f32 %v75_v10, %v197_v28  ;;  %v2570_v56 = vsub.f32 %v25_v5, %v2536_v25 }
  0x20   :  { %3663 = vst [vmem:[#allocation30_spill] sm:$0xff] %v2552_v41  ;;  %1943 = vmatpush1.bf16.msra.mxu1 %v2504_v6  ;;  %2051 = vmatpush1.bf16.msra.mxu0 %v2504_v6  ;;  %v2575_v61 = vpack.c.bf16 %v200_v29, %v197_v28  ;;  %v2577_v63 = vand.u32 4294901760, %v79_v35  ;;  %v470_v3 = vsub.f32 %v2424_v30, %v469_v31  ;;  %v483_v57 = vand.u32 4294901760, %v2440_v38 }
  0x21   :  { %1944 = vmatprep.subr.bf16.mxu1 %v3534_v4  ;;  %2052 = vmatprep.subr.bf16.mxu0 %v3534_v4  ;;  %3664 = vst [vmem:[#allocation31_spill] sm:$0xff] %v2570_v56  ;;  %v477_v9 = vsub.f32 %v2438_v37, %v476_v40  ;;  %v2586_v5 = vsub.f32 %v92_v17, %v2552_v41  ;;  %v2588_v10 = vand.u32 4294901760, %v95_v46  ;;  %v98_v16 = vsel %vm87_vm0, %v30_v52, 0  ;;  %v29_v17 = vld [vmem:[%s3528_s0 + $0x30] sm:$0xff] }
  0x22   :  { %3665 = vst [vmem:[#allocation32_spill] sm:$0xff] %v2575_v61  ;;  %3666 = vst [vmem:[#allocation33_spill] sm:$0xff] %v2577_v63  ;;  %v2593_v26 = vsub.f32 %v76_v11, %v200_v29  ;;  %v2595_v28 = vpack.c.bf16 %v206_v48, %v203_v45  ;;  %v490_v58 = vand.u32 4294901760, %v2442_v39  ;;  %v2598_v4 = vand.u32 4294901760, %v27_v60 }
  0x23   :  { %3667 = vst [vmem:[#allocation34_spill] sm:$0xff] %v2586_v5  ;;  %3668 = vst [vmem:[#allocation35_spill] sm:$0xff] %v2588_v10  ;;  %v2605_v52 = vsub.f32 %v77_v21, %v203_v45  ;;  %v101_v6 = vsel %vm87_vm0, %v32_v8, 0  ;;  %v2614_v53 = vsub.f32 %v78_v22, %v206_v48  ;;  %v471_v32 = vand.u32 4294901760, %v470_v3  ;;  %v31_v21 = vld [vmem:[%s3528_s0 + $0x40] sm:$0xff] }
  0x24   :  { %1946 = vmatpush1.bf16.msra.mxu1 %v2516_v14  ;;  %2054 = vmatpush1.bf16.msra.mxu0 %v2516_v14  ;;  %3669 = vst [vmem:[#allocation36_spill] sm:$0xff] %v2595_v28  ;;  %3670 = vst [vmem:[#allocation37_spill] sm:$0xff] %v2598_v4  ;;  %v3673_v14 = vand.u32 4294901760, %v2534_v23  ;;  %v484_v24 = vsub.f32 %v2440_v38, %v483_v57  ;;  %v2617_v18 = vand.u32 4294901760, %v98_v16  ;;  %v478_v45 = vand.u32 4294901760, %v477_v9 }
  0x25   :  { %1947 = vmatprep.subr.bf16.mxu1 %v3671_v47  ;;  %2055 = vmatprep.subr.bf16.mxu0 %v3671_v47  ;;  %3672 = vst [vmem:[#allocation38_spill] sm:$0xff] %v2605_v52  ;;  %3674 = vst [vmem:[#allocation39_spill] sm:$0xff] %v2614_v53  ;;  %v2626_v29 = vand.u32 4294901760, %v29_v17  ;;  %v2631_v22 = vsub.f32 %v79_v35, %v2577_v63  ;;  %v491_v48 = vsub.f32 %v2442_v39, %v490_v58  ;;  %v42_v39 = vld [vmem:[%s3528_s0 + $0x98] sm:$0xff] }
  0x26   :  { %v2610_v11 = vsub.f32 %v2534_v23, %v3673_v14  ;;  %3675 = vst [vmem:[#allocation40_spill] sm:$0xff] %v2617_v18  ;;  %v2624_v14 = vsub.f32 %v95_v46, %v2588_v10  ;;  %v2635_v3 = vsub.f32 %v27_v60, %v2598_v4  ;;  %v2637_v8 = vand.u32 4294901760, %v101_v6  ;;  %v34_v60 = vld [vmem:[%s3528_s0 + $0x58] sm:$0xff] }
  0x27   :  { %3677 = vst [vmem:[#allocation42_spill] sm:$0xff] %v2626_v29  ;;  %3678 = vst [vmem:[#allocation43_spill] sm:$0xff] %v2631_v22  ;;  %v2642_v9 = vpack.c.bf16 %v476_v40, %v469_v31  ;;  %v3681_v13 = vand.u32 4294901760, %v2570_v56  ;;  %v485_v4 = vand.u32 4294901760, %v484_v24  ;;  %v2655_v10 = vsub.f32 %v98_v16, %v2617_v18 }
  0x28   :  { %3676 = vst [vmem:[#allocation41_spill] sm:$0xff] %v2624_v14  ;;  %1949 = vmatpush1.bf16.msra.mxu1 %v2525_v20  ;;  %2057 = vmatpush1.bf16.msra.mxu0 %v2525_v20  ;;  %3679 = vst [vmem:[#allocation44_spill] sm:$0xff] %v2635_v3  ;;  %v2649_v20 = vand.u32 4294901760, %v31_v21  ;;  %v497_v25 = vand.u32 4294901760, %v2452_v42  ;;  %v504_v31 = vand.u32 4294901760, %v2454_v43  ;;  %v2659_v40 = vpack.c.bf16 %v478_v45, %v471_v32 }
  0x29   :  { %3680 = vst [vmem:[#allocation45_spill] sm:$0xff] %v2637_v8  ;;  %1950 = vmatprep.subr.bf16.mxu1 %v3671_v47  ;;  %2058 = vmatprep.subr.bf16.mxu0 %v3671_v47  ;;  %v2647_v35 = vsub.f32 %v2570_v56, %v3681_v13  ;;  %3683 = vst [vmem:[#allocation47_spill] sm:$0xff] %v2655_v10  ;;  %v3684_v46 = vand.u32 4294901760, %v2586_v5  ;;  %v2668_v41 = vsub.f32 %v29_v17, %v2626_v29 }
  0x2a   :  { %3682 = vst [vmem:[#allocation46_spill] sm:$0xff] %v2649_v20  ;;  %v492_v24 = vand.u32 4294901760, %v491_v48  ;;  %v2674_v32 = vsub.f32 %v101_v6, %v2637_v8  ;;  %v104_v45 = vsel %vm87_vm0, %v34_v60, 0  ;;  %v2681_v17 = vsub.f32 %v31_v21, %v2649_v20  ;;  %v36_v8 = vld [vmem:[%s3528_s0 + $0x68] sm:$0xff]  ;;  %v33_v6 = vld [vmem:[%s3528_s0 + $0x50] sm:$0xff] }
  0x2b   :  { %v2664_v13 = vsub.f32 %v2586_v5, %v3684_v46  ;;  %3685 = vst [vmem:[#allocation48_spill] sm:$0xff] %v2668_v41  ;;  %v511_v12 = vand.u32 4294901760, %v2468_v49  ;;  %v518_v48 = vand.u32 4294901760, %v2470_v50  ;;  %v498_v16 = vsub.f32 %v2452_v42, %v497_v25 }
  0x2c   :  { %1952 = vmatpush1.bf16.msra.mxu1 %v2546_v34  ;;  %2060 = vmatpush1.bf16.msra.mxu0 %v2546_v34  ;;  %3686 = vst [vmem:[#allocation49_spill] sm:$0xff] %v2674_v32  ;;  %3687 = vst [vmem:[#allocation50_spill] sm:$0xff] %v2681_v17  ;;  %v2685_v34 = vpack.c.bf16 %v490_v58, %v483_v57  ;;  %v505_v60 = vsub.f32 %v2454_v43, %v504_v31  ;;  %v3688_v21 = vand.u32 4294901760, %v2624_v14  ;;  %v3586_v43 = vmov 0.0  }
  0x2d   :  { %1953 = vmatprep.subr.bf16.mxu1 %v3671_v47  ;;  %2061 = vmatprep.subr.bf16.mxu0 %v3671_v47  ;;  %v2700_v57 = vand.u32 4294901760, %v104_v45  ;;  %v2707_v29 = vpack.c.bf16 %v492_v24, %v485_v4  ;;  %v3690_v46 = vand.u32 4294901760, %v2635_v3  ;;  %v512_v37 = vsub.f32 %v2468_v49, %v511_v12 }
  0x2e   :  { %v2697_v20 = vsub.f32 %v2624_v14, %v3688_v21  ;;  %v2714_v21 = vpack.c.bf16 %v504_v31, %v497_v25  ;;  %v519_v4 = vsub.f32 %v2470_v50, %v518_v48  ;;  %v107_v24 = vsel %vm87_vm0, %v36_v8, 0  ;;  %v38_v25 = vld [vmem:[%s3528_s0 + $0x78] sm:$0xff] }
  0x2f   :  { %3689 = vst [vmem:[#allocation51_spill] sm:$0xff] %v2700_v57  ;;  %v2712_v18 = vsub.f32 %v2635_v3, %v3690_v46  ;;  %v35_v46 = vld [vmem:[%s3528_s0 + $0x60] sm:$0xff]  ;;  %v3691_v31 = vand.u32 4294901760, %v2655_v10  ;;  %v499_v62 = vand.u32 4294901760, %v498_v16  ;;  %v2734_v30 = vand.u32 4294901760, %v33_v6 }
  0x30   :  { %1955 = vmatpush1.bf16.msra.mxu1 %v2575_v61  ;;  %2063 = vmatpush1.bf16.msra.mxu0 %v2575_v61  ;;  %v506_v61 = vand.u32 4294901760, %v505_v60  ;;  %v3693_v8 = vand.u32 4294901760, %v2668_v41  ;;  %v2743_v50 = vsub.f32 %v104_v45, %v2700_v57  ;;  %v525_v49 = vand.u32 4294901760, %v2472_v51 }
  0x31   :  { %1956 = vmatprep.subr.bf16.mxu1 %v3671_v47  ;;  %2064 = vmatprep.subr.bf16.mxu0 %v3671_v47  ;;  %v2732_v58 = vsub.f32 %v2655_v10, %v3691_v31  ;;  %3692 = vst [vmem:[#allocation52_spill] sm:$0xff] %v2734_v30  ;;  %v2749_v60 = vand.u32 4294901760, %v107_v24  ;;  %v2751_v31 = vand.u32 4294901760, %v35_v46  ;;  %v110_v36 = vsel %vm87_vm0, %v38_v25, 0  ;;  %v37_v25 = vld [vmem:[%s3528_s0 + $0x70] sm:$0xff] }
  0x32   :  { %v2740_v22 = vsub.f32 %v2668_v41, %v3693_v8  ;;  %3694 = vst [vmem:[#allocation53_spill] sm:$0xff] %v2743_v50  ;;  %v3697_v45 = vand.u32 4294901760, %v2674_v32  ;;  %v513_v57 = vand.u32 4294901760, %v512_v37  ;;  %v520_v42 = vand.u32 4294901760, %v519_v4 }
  0x33   :  { %3695 = vst [vmem:[#allocation54_spill] sm:$0xff] %v2749_v60  ;;  %3696 = vst [vmem:[#allocation55_spill] sm:$0xff] %v2751_v31  ;;  %v2770_v38 = vpack.c.bf16 %v506_v61, %v499_v62  ;;  %v2782_v53 = vsub.f32 %v2472_v51, %v525_v49  ;;  %v2784_v52 = vand.u32 4294901760, %v110_v36  ;;  %v2788_v62 = vpack.c.bf16 %v518_v48, %v511_v12 }
  0x34   :  { %1958 = vmatpush1.bf16.msra.mxu1 %v2595_v28  ;;  %2066 = vmatpush1.bf16.msra.mxu0 %v2595_v28  ;;  %v2759_v8 = vsub.f32 %v2674_v32, %v3697_v45  ;;  %v3698_v28 = vand.u32 4294901760, %v2681_v17  ;;  %v532_v45 = vand.u32 4294901760, %v2485_v59  ;;  %v2791_v61 = vsub.f32 %v107_v24, %v2749_v60 }
  0x35   :  { %208 = vmatprep.subr.mxu1 %v3586_v43  ;;  %1099 = vmatprep.subr.mxu0 %v3586_v43  ;;  %v2773_v43 = vsub.f32 %v33_v6, %v2734_v30  ;;  %3700 = vst [vmem:[#allocation57_spill] sm:$0xff] %v2784_v52  ;;  %v2794_v6 = vsub.f32 %v35_v46, %v2751_v31  ;;  %v2796_v37 = vand.u32 4294901760, %v37_v25  ;;  %v3704_v4 = vand.u32 4294901760, %v2610_v11 }
  0x36   :  { %v2764_v16 = vsub.f32 %v2681_v17, %v3698_v28  ;;  %v40_v28 = vld [vmem:[%s3528_s0 + $0x88] sm:$0xff]  ;;  %3701 = vst [vmem:[#allocation58_spill] sm:$0xff] %v2791_v61  ;;  %v2806_v24 = vpack.c.bf16 %v520_v42, %v513_v57  ;;  %v533_v11 = vsub.f32 %v2485_v59, %v532_v45  ;;  %v546_v60 = vand.u32 4294901760, %v2496_v1  ;;  %v39_v42 = vld [vmem:[%s3528_s0 + $0x80] sm:$0xff] }
  0x37   :  { %3699 = vst [vmem:[#allocation56_spill] sm:$0xff] %v2773_v43  ;;  %3702 = vst [vmem:[#allocation59_spill] sm:$0xff] %v2794_v6  ;;  %v113_v46 = vsel %vm87_vm0, %v40_v28, 0  ;;  %v3706_v57 = vand.u32 4294901760, %v2664_v13  ;;  %v527_v28 = vand.u32 4294901760, %v2782_v53  ;;  %v2829_v48 = vsub.f32 %v110_v36, %v2784_v52  ;;  %v41_v36 = vld [vmem:[%s3528_s0 + $0x90] sm:$0xff] }
  0x38   :  { %210 = vmatpush1.msra.mxu1 %v2577_v63  ;;  %1101 = vmatpush1.msra.mxu0 %v2577_v63  ;;  %3703 = vst [vmem:[#allocation60_spill] sm:$0xff] %v2796_v37  ;;  %v3705_v63 = vand.u32 4294901760, %v2534_v23  ;;  %v116_v12 = vsel %vm87_vm0, %v42_v39, 0  ;;  %v3709_v31 = vand.u32 4294901760, %v2586_v5  ;;  %v2838_v23 = vsub.f32 %v37_v25, %v2796_v37 }
  0x39   :  { %236 = vmatmul.mubr.f32.vlgmr.msra.gmra.mrb[0].mxu1 %v3704_v4  ;;  %1959 = vmatprep.subr.bf16.mxu1 %v3671_v47  ;;  %v539_v4 = vand.u32 4294901760, %v2494_v0  ;;  %3708 = vst [vmem:[#allocation61_spill] sm:$0xff] %v2829_v48  ;;  %v3712_v39 = vand.u32 4294901760, %v2647_v35  ;;  %v2848_v53 = vpack.c.bf16 %v532_v45, %v525_v49  ;;  %v3713_v25 = vand.u32 4294901760, %v2570_v56  ;;  %v44_v49 = vld [vmem:[%s3528_s0 + $0xa8] sm:$0xff] }
  0x3a   :  { %1123 = vmatmul.mubr.f32.vlgmr.msra.gmra.mrb[0].mxu0 %v3705_v63  ;;  %1961 = vmatpush1.bf16.msra.mxu1 %v2659_v40  ;;  %v3707_v63 = vand.u32 4294901760, %v2743_v50  ;;  %3710 = vst [vmem:[#allocation62_spill] sm:$0xff] %v2838_v23  ;;  %v534_v13 = vand.u32 4294901760, %v533_v11  ;;  %v547_v35 = vsub.f32 %v2496_v1, %v546_v60  ;;  %v3714_v45 = vand.u32 4294901760, %v2697_v20 }
  0x3b   :  { %2067 = vmatprep.subr.bf16.mxu0 %v3671_v47  ;;  %245 = vmatprep.mubr.f32.mxu1 %v3706_v57  ;;  %v2852_v57 = vand.u32 4294901760, %v39_v42  ;;  %v540_v5 = vsub.f32 %v2494_v0, %v539_v4  ;;  %v2875_v37 = vand.u32 4294901760, %v41_v36  ;;  %v3717_v20 = vand.u32 4294901760, %v2791_v61 }
  0x3c   :  { %v2825_v40 = vsub.f32 %v2743_v50, %v3707_v63  ;;  %1130 = vmatprep.mubr.f32.mxu0 %v3709_v31  ;;  %2069 = vmatpush1.bf16.msra.mxu0 %v2642_v9  ;;  %v2840_v63 = vand.u32 4294901760, %v113_v46  ;;  %v560_v31 = vand.u32 4294901760, %v2506_v7  ;;  %v3715_v9 = vand.u32 4294901760, %v2624_v14 }
  0x3d   :  { %251 = vmatmul.mubr.f32.gmra.mrb[2].mxu1 %v3712_v39  ;;  %1962 = vmatprep.subr.bf16.mxu1 %v3671_v47  ;;  %v2859_v39 = vand.u32 4294901760, %v116_v12  ;;  %v3720_v14 = vand.u32 4294901760, %v2712_v18  ;;  %v3721_v52 = vand.u32 4294901760, %v2498_v2  ;;  %v2901_v1 = vsub.f32 %v39_v42, %v2852_v57 }
  0x3e   :  { %3711 = vst [vmem:[#allocation63_spill] sm:$0xff] %v2840_v63  ;;  %1134 = vmatmul.mubr.f32.gmra.mrb[2].mxu0 %v3713_v25  ;;  %1964 = vmatpush1.bf16.msra.mxu1 %v2707_v29  ;;  %v3716_v29 = vand.u32 4294901760, %v2773_v43  ;;  %v2891_v56 = vsub.f32 %v113_v46, %v2840_v63  ;;  %v561_v30 = vsub.f32 %v2506_v7, %v560_v31  ;;  %v3724_v46 = vand.u32 4294901760, %v2732_v58 }
  0x3f   :  { %260 = vmatprep.mubr.f32.mxu1 %v3714_v45  ;;  %1141 = vmatprep.mubr.f32.mxu0 %v3715_v9  ;;  %v2882_v45 = vsub.f32 %v2791_v61, %v3717_v20  ;;  %v3718_v9 = vand.u32 4294901760, %v2794_v6  ;;  %v554_v20 = vsub.f32 %v2498_v2, %v3721_v52  ;;  %3722 = vst [vmem:[#allocation65_spill] sm:$0xff] %v2901_v1  ;;  %v3726_v52 = vand.u32 4294901760, %v2655_v10 }
  0x40   :  { %v2872_v11 = vsub.f32 %v2773_v43, %v3716_v29  ;;  %2070 = vmatprep.subr.bf16.mxu0 %v3671_v47  ;;  %1965 = vmatprep.subr.bf16.mxu1 %v3671_v47  ;;  %3719 = vst [vmem:[#allocation64_spill] sm:$0xff] %v2891_v56  ;;  %v3723_v29 = vand.u32 4294901760, %v2635_v3  ;;  %v1972_v18 = vpack.c.bf16 %v534_v13, %v527_v28  ;;  %v3609_v13 = vand.u32 4294901760, %v2891_v56 }
  0x41   :  { %v2887_v25 = vsub.f32 %v2794_v6, %v3718_v9  ;;  %266 = vmatmul.mubr.f32.gmra.mrb[4].mxu1 %v3720_v14  ;;  %2072 = vmatpush1.bf16.msra.mxu0 %v2685_v34  ;;  %v119_v9 = vsel %vm87_vm0, %v44_v49, 0  ;;  %v541_v14 = vand.u32 4294901760, %v540_v5  ;;  %v548_v34 = vand.u32 4294901760, %v547_v35 }
  0x42   :  { %1145 = vmatmul.mubr.f32.gmra.mrb[4].mxu0 %v3723_v29  ;;  %275 = vmatprep.mubr.f32.mxu1 %v3724_v46  ;;  %v2909_v63 = vsub.f32 %v116_v12, %v2859_v39  ;;  %v310_v42 = vand.u32 4294901760, %v2872_v11  ;;  %v3727_v49 = vand.u32 4294901760, %v2829_v48  ;;  %v2920_v58 = vpack.c.bf16 %v546_v60, %v539_v4  ;;  %v46_v60 = vld [vmem:[%s3528_s0 + $0xb8] sm:$0xff] }
  0x43   :  { %1967 = vmatpush1.bf16.msra.mxu1 %v2770_v38  ;;  %1152 = vmatprep.mubr.f32.mxu0 %v3726_v52  ;;  %v2923_v5 = vsub.f32 %v41_v36, %v2875_v37  ;;  %v3729_v12 = vand.u32 4294901760, %v2838_v23  ;;  %v2934_v35 = vand.u32 4294901760, %v119_v9  ;;  %v3730_v4 = vand.u32 4294901760, %v2740_v22 }
  0x44   :  { %3725 = vst [vmem:[#allocation66_spill] sm:$0xff] %v2909_v63  ;;  %v2918_v29 = vsub.f32 %v2829_v48, %v3727_v49  ;;  %2073 = vmatprep.subr.bf16.mxu0 %v3671_v47  ;;  %1968 = vmatprep.subr.bf16.mxu1 %v3671_v47  ;;  %v319_v36 = vand.u32 4294901760, %v2882_v45  ;;  %v555_v11 = vand.u32 4294901760, %v554_v20  ;;  %v562_v46 = vand.u32 4294901760, %v561_v30  ;;  %v43_v49 = vld [vmem:[%s3528_s0 + $0xa0] sm:$0xff] }
  0x45   :  { %3728 = vst [vmem:[#allocation67_spill] sm:$0xff] %v2923_v5  ;;  %v2931_v28 = vsub.f32 %v2838_v23, %v3729_v12  ;;  %281 = vmatmul.mubr.f32.gmra.mrb[6].mxu1 %v3730_v4  ;;  %2075 = vmatpush1.bf16.msra.mxu0 %v2714_v21  ;;  %v3731_v12 = vand.u32 4294901760, %v2668_v41  ;;  %v3732_v38 = vand.u32 4294901760, %v2759_v8  ;;  %v1975_v22 = vpack.c.bf16 %v548_v34, %v541_v14 }
  0x46   :  { %v567_v21 = vand.u32 4294901760, %v2518_v15  ;;  %v574_v45 = vand.u32 4294901760, %v2523_v19  ;;  %v3733_v30 = vand.u32 4294901760, %v2674_v32  ;;  %v3734_v52 = vand.u32 4294901760, %v2498_v2  ;;  %2076 = vmatprep.subr.bf16.mxu0 %v3671_v47 }
  0x47   :  { %1156 = vmatmul.mubr.f32.gmra.mrb[6].mxu0 %v3731_v12  ;;  %290 = vmatprep.mubr.f32.mxu1 %v3732_v38  ;;  %v122_v14 = vsel %vm87_vm0, %v46_v60, 0  ;;  %v2973_v38 = vsub.f32 %v119_v9, %v2934_v35  ;;  %v48_v60 = vld [vmem:[%s3528_s0 + $0xc8] sm:$0xff]  ;;  %v3737_v34 = vand.u32 4294901760, %v2901_v1  ;;  %v581_v9 = vand.u32 4294901760, %v2541_v27 }
  0x48   :  { %1163 = vmatprep.mubr.f32.mxu0 %v3733_v30  ;;  %1970 = vmatpush1.bf16.msra.mxu1 %v2806_v24  ;;  %v2960_v12 = vpack.c.bf16 %v560_v31, %v3734_v52  ;;  %v2970_v24 = vsub.f32 %v2891_v56, %v3609_v13  ;;  %v2975_v31 = vand.u32 4294901760, %v43_v49  ;;  %v3736_v52 = vand.u32 4294901760, %v2764_v16 }
  0x49   :  { %1971 = vmatprep.subr.bf16.mxu1 %v3671_v47  ;;  %3735 = vst [vmem:[#allocation68_spill] sm:$0xff] %v2973_v38  ;;  %2078 = vmatpush1.bf16.msra.mxu0 %v2788_v62  ;;  %v1978_v30 = vpack.c.bf16 %v562_v46, %v555_v11  ;;  %v2986_v13 = vsub.f32 %v2901_v1, %v3737_v34  ;;  %v588_v20 = vand.u32 4294901760, %v2544_v33  ;;  %v3738_v8 = vand.u32 4294901760, %v2681_v17 }
  0x4a   :  { %296 = vmatmul.mubr.f32.gmra.mrb[8].mxu1 %v3736_v52  ;;  %v3739_v4 = vand.u32 4294901760, %v2825_v40  ;;  %v3740_v16 = vand.u32 4294901760, %v2909_v63  ;;  %v568_v11 = vsub.f32 %v2518_v15, %v567_v21  ;;  %v575_v46 = vsub.f32 %v2523_v19, %v574_v45  ;;  %v45_v52 = vld [vmem:[%s3528_s0 + $0xb0] sm:$0xff]  ;;  %2079 = vmatprep.subr.bf16.mxu0 %v3671_v47 }
  0x4b   :  { %1167 = vmatmul.mubr.f32.gmra.mrb[8].mxu0 %v3738_v8  ;;  %v3001_v34 = vand.u32 4294901760, %v122_v14  ;;  %v3742_v8 = vand.u32 4294901760, %v2743_v50  ;;  %v3743_v40 = vand.u32 4294901760, %v2923_v5  ;;  %v125_v32 = vsel %vm87_vm0, %v48_v60, 0 }
  0x4c   :  { %305 = vmatprep.mubr.f32.mxu1 %v3739_v4  ;;  %v2997_v62 = vsub.f32 %v2909_v63, %v3740_v16  ;;  %1973 = vmatpush1.bf16.msra.mxu1 %v1972_v18  ;;  %v349_v41 = vand.u32 4294901760, %v2970_v24  ;;  %v3019_v50 = vpack.c.bf16 %v574_v45, %v567_v21  ;;  %v582_v60 = vsub.f32 %v2541_v27, %v581_v9  ;;  %v50_v21 = vld [vmem:[%s3528_s0 + $0xd8] sm:$0xff] }
  0x4d   :  { %3741 = vst [vmem:[#allocation69_spill] sm:$0xff] %v3001_v34  ;;  %1174 = vmatprep.mubr.f32.mxu0 %v3742_v8  ;;  %v3011_v4 = vsub.f32 %v2923_v5, %v3743_v40  ;;  %1974 = vmatprep.subr.bf16.mxu1 %v3671_v47  ;;  %v3023_v8 = vsub.f32 %v43_v49, %v2975_v31  ;;  %v3029_v16 = vand.u32 4294901760, %v45_v52  ;;  %v3744_v45 = vand.u32 4294901760, %v2773_v43 }
  0x4e   :  { %311 = vmatmul.mubr.f32.gmra.mrb[10].mxu1 %v310_v42  ;;  %2081 = vmatpush1.bf16.msra.mxu0 %v2848_v53  ;;  %v589_v17 = vsub.f32 %v2544_v33, %v588_v20  ;;  %v569_v49 = vand.u32 4294901760, %v568_v11  ;;  %v576_v42 = vand.u32 4294901760, %v575_v46  ;;  %v3037_v53 = vsub.f32 %v122_v14, %v3001_v34  ;;  %v47_v14 = vld [vmem:[%s3528_s0 + $0xc0] sm:$0xff] }
  0x4f   :  { %1178 = vmatmul.mubr.f32.gmra.mrb[10].mxu0 %v3744_v45  ;;  %320 = vmatprep.mubr.f32.mxu1 %v319_v36  ;;  %v3039_v24 = vand.u32 4294901760, %v125_v32  ;;  %v3746_v40 = vand.u32 4294901760, %v2791_v61  ;;  %v3747_v3 = vand.u32 4294901760, %v2556_v44  ;;  %v3748_v36 = vand.u32 4294901760, %v2564_v54 }
  0x50   :  { %1976 = vmatpush1.bf16.msra.mxu1 %v1975_v22  ;;  %2082 = vmatprep.subr.bf16.mxu0 %v3671_v47  ;;  %v3749_v22 = vand.u32 4294901760, %v2973_v38  ;;  %v583_v18 = vand.u32 4294901760, %v582_v60  ;;  %v590_v61 = vand.u32 4294901760, %v589_v17  ;;  %v3068_v43 = vsub.f32 %v45_v52, %v3029_v16 }
  0x51   :  { %3745 = vst [vmem:[#allocation70_spill] sm:$0xff] %v3039_v24  ;;  %1185 = vmatprep.mubr.f32.mxu0 %v3746_v40  ;;  %v596_v45 = vsub.f32 %v2556_v44, %v3747_v3  ;;  %v603_v11 = vsub.f32 %v2564_v54, %v3748_v36  ;;  %1977 = vmatprep.subr.bf16.mxu1 %v3671_v47  ;;  %v128_v3 = vsel %vm87_vm0, %v50_v21, 0  ;;  %v3750_v36 = vand.u32 4294901760, %v2887_v25 }
  0x52   :  { %v3059_v46 = vsub.f32 %v2973_v38, %v3749_v22  ;;  %2084 = vmatpush1.bf16.msra.mxu0 %v2920_v58  ;;  %v3751_v22 = vand.u32 4294901760, %v2794_v6  ;;  %v3752_v40 = vand.u32 4294901760, %v2918_v29  ;;  %v1981_v21 = vpack.c.bf16 %v576_v42, %v569_v49 }
  0x53   :  { %326 = vmatmul.mubr.f32.gmra.mrb[12].mxu1 %v3750_v36  ;;  %v3077_v25 = vsub.f32 %v125_v32, %v3039_v24  ;;  %v3079_v58 = vand.u32 4294901760, %v47_v14  ;;  %v3754_v17 = vand.u32 4294901760, %v2829_v48  ;;  %v2092_v52 = vpack.c.bf16 %v588_v20, %v581_v9  ;;  %2085 = vmatprep.subr.bf16.mxu0 %v3671_v47  ;;  %v49_v20 = vld [vmem:[%s3528_s0 + $0xd0] sm:$0xff]  ;;  %v52_v9 = vld [vmem:[%s3528_s0 + $0xe8] sm:$0xff] }
  0x54   :  { %1189 = vmatmul.mubr.f32.gmra.mrb[12].mxu0 %v3751_v22  ;;  %335 = vmatprep.mubr.f32.mxu1 %v3752_v40  ;;  %v597_v60 = vand.u32 4294901760, %v596_v45  ;;  %v604_v36 = vand.u32 4294901760, %v603_v11  ;;  %v3083_v34 = vand.u32 4294901760, %v128_v3  ;;  %v379_v29 = vand.u32 4294901760, %v3059_v46  ;;  %v3758_v45 = vld [vmem:[#allocation38_spill] sm:$0xff] }
  0x55   :  { %3753 = vst [vmem:[#allocation71_spill] sm:$0xff] %v3079_v58  ;;  %1196 = vmatprep.mubr.f32.mxu0 %v3754_v17  ;;  %1979 = vmatpush1.bf16.msra.mxu1 %v1978_v30  ;;  %v3756_v32 = vand.u32 4294901760, %v3023_v8  ;;  %v3757_v42 = vand.u32 4294901760, %v2566_v55  ;;  %v3759_v46 = vand.u32 4294901760, %v2931_v28  ;;  %v1984_v40 = vpack.c.bf16 %v590_v61, %v583_v18  ;;  %v3764_v18 = vld [vmem:[#allocation14_spill] sm:$0xff] }
  0x56   :  { %3755 = vst [vmem:[#allocation72_spill] sm:$0xff] %v3083_v34  ;;  %1980 = vmatprep.subr.bf16.mxu1 %v3671_v47  ;;  %2087 = vmatpush1.bf16.msra.mxu0 %v2960_v12  ;;  %v3760_v17 = vand.u32 4294901760, %v2593_v26  ;;  %v3762_v48 = vand.u32 4294901760, %v2838_v23  ;;  %v3763_v11 = vand.u32 4294901760, %v3037_v53  ;;  %v3122_v61 = vsub.f32 %v47_v14, %v3079_v58  ;;  %v3775_v58 = vld [vmem:[#allocation23_spill] sm:$0xff] }
  0x57   :  { %v3091_v49 = vsub.f32 %v3023_v8, %v3756_v32  ;;  %v3096_v30 = vsub.f32 %v2566_v55, %v3757_v42  ;;  %341 = vmatmul.mubr.f32.gmra.mrb[14].mxu1 %v3759_v46  ;;  %v3761_v42 = vld [vmem:[#allocation39_spill] sm:$0xff]  ;;  %v1987_v10 = vpack.c.bf16 %v604_v36, %v597_v60  ;;  %2088 = vmatprep.subr.bf16.mxu0 %v3671_v47  ;;  %v3768_v22 = vand.u32 4294901760, %v3758_v45  ;;  %v3770_v60 = vld [vmem:[#allocation17_spill] sm:$0xff] }
  0x58   :  { %v617_v32 = vsub.f32 %v2593_v26, %v3760_v17  ;;  %1200 = vmatmul.mubr.f32.gmra.mrb[14].mxu0 %v3762_v48  ;;  %350 = vmatprep.mubr.f32.mxu1 %v349_v41  ;;  %v3118_v28 = vsub.f32 %v3037_v53, %v3763_v11  ;;  %v3765_v46 = vld [vmem:[#allocation15_spill] sm:$0xff]  ;;  %v3766_v17 = vand.u32 4294901760, %v2891_v56  ;;  %v3129_v41 = vsub.f32 %v128_v3, %v3083_v34  ;;  %v54_v3 = vld [vmem:[%s3528_s0 + $0xf8] sm:$0xff] }
  0x59   :  { %1982 = vmatpush1.bf16.msra.mxu1 %v1981_v21  ;;  %v3131_v48 = vand.u32 4294901760, %v49_v20  ;;  %v131_v11 = vsel %vm87_vm0, %v52_v9, 0  ;;  %v611_v14 = vand.u32 4294901760, %v3096_v30  ;;  %v3140_v12 = vsub.f32 %v3758_v45, %v3768_v22  ;;  %v3769_v21 = vld [vmem:[#allocation16_spill] sm:$0xff] }
  0x5a   :  { %1207 = vmatprep.mubr.f32.mxu0 %v3766_v17  ;;  %1983 = vmatprep.subr.bf16.mxu1 %v3671_v47  ;;  %v3771_v17 = vld [vmem:[#allocation19_spill] sm:$0xff]  ;;  %v3772_v9 = vld [vmem:[#allocation20_spill] sm:$0xff]  ;;  %v3773_v23 = vand.u32 4294901760, %v2986_v13  ;;  %v618_v30 = vand.u32 4294901760, %v617_v32  ;;  %v3774_v6 = vand.u32 4294901760, %v3761_v42  ;;  %v3776_v36 = vand.u32 4294901760, %v2901_v1 }
  0x5b   :  { %3767 = vst [vmem:[#allocation38_spill] sm:$0xff] %v3131_v48  ;;  %2090 = vmatpush1.bf16.msra.mxu0 %v3019_v50  ;;  %v3777_v56 = vand.u32 4294901760, %v2997_v62  ;;  %v51_v50 = vld [vmem:[%s3528_s0 + $0xe0] sm:$0xff]  ;;  %v385_v13 = vand.u32 4294901760, %v3091_v49  ;;  %v3780_v32 = vand.u32 4294901760, %v3068_v43  ;;  %v394_v24 = vand.u32 4294901760, %v3118_v28 }
  0x5c   :  { %356 = vmatmul.mubr.f32.gmra.mrb[16].mxu1 %v3773_v23  ;;  %v631_v22 = vsub.f32 %v3761_v42, %v3774_v6  ;;  %1211 = vmatmul.mubr.f32.gmra.mrb[16].mxu0 %v3776_v36  ;;  %v3163_v23 = vand.u32 4294901760, %v131_v11  ;;  %v3779_v36 = vand.u32 4294901760, %v2909_v63  ;;  %v3782_v6 = vand.u32 4294901760, %v2556_v44 }
  0x5d   :  { %365 = vmatprep.mubr.f32.mxu1 %v3777_v56  ;;  %1985 = vmatpush1.bf16.msra.mxu1 %v1984_v40  ;;  %v134_v56 = vsel %vm87_vm0, %v54_v3, 0  ;;  %v3781_v3 = vand.u32 4294901760, %v3011_v4  ;;  %v3783_v49 = vand.u32 4294901760, %v2564_v54  ;;  %v3198_v34 = vsub.f32 %v49_v20, %v3131_v48  ;;  %v53_v20 = vld [vmem:[%s3528_s0 + $0xf0] sm:$0xff] }
  0x5e   :  { %3778 = vst [vmem:[#allocation39_spill] sm:$0xff] %v3163_v23  ;;  %1218 = vmatprep.mubr.f32.mxu0 %v3779_v36  ;;  %2091 = vmatprep.subr.bf16.mxu0 %v3671_v47  ;;  %v399_v36 = vsub.f32 %v3068_v43, %v3780_v32  ;;  %v3200_v63 = vand.u32 4294901760, %v51_v50  ;;  %v3785_v32 = vand.u32 4294901760, %v2923_v5  ;;  %v3786_v4 = vand.u32 4294901760, %v3077_v25 }
  0x5f   :  { %1986 = vmatprep.subr.bf16.mxu1 %v3671_v47  ;;  %2093 = vmatpush1.bf16.msra.mxu0 %v2092_v52  ;;  %v2095_v62 = vpack.c.bf16 %v3783_v49, %v3782_v6  ;;  %3784 = vst [vmem:[#allocation14_spill] sm:$0xff] %v3198_v34  ;;  %v422_v52 = vand.u32 4294901760, %v3129_v41  ;;  %v3209_v28 = vsub.f32 %v131_v11, %v3163_v23  ;;  %v3211_v40 = vand.u32 4294901760, %v134_v56 }
  0x60   :  { %371 = vmatmul.mubr.f32.gmra.mrb[18].mxu1 %v3781_v3  ;;  %1222 = vmatmul.mubr.f32.gmra.mrb[18].mxu0 %v3785_v32  ;;  %v408_v3 = vsub.f32 %v3077_v25, %v3786_v4  ;;  %v3787_v6 = vand.u32 4294901760, %v2973_v38  ;;  %v625_v49 = vand.u32 4294901760, %v3140_v12  ;;  %v632_v32 = vand.u32 4294901760, %v631_v22  ;;  %v3788_v4 = vld [vmem:[#allocation43_spill] sm:$0xff] }
  0x61   :  { %380 = vmatprep.mubr.f32.mxu1 %v379_v29  ;;  %1988 = vmatpush1.bf16.msra.mxu1 %v1987_v10  ;;  %v1990_v29 = vpack.c.bf16 %v618_v30, %v611_v14  ;;  %v637_v5 = vand.u32 4294901760, %v3788_v4  ;;  %v400_v1 = vand.u32 4294901760, %v399_v36  ;;  %v3789_v11 = vand.u32 4294901760, %v3122_v61 }
  0x62   :  { %1229 = vmatprep.mubr.f32.mxu0 %v3787_v6  ;;  %2094 = vmatprep.subr.bf16.mxu0 %v3671_v47  ;;  %v428_v6 = vand.u32 4294901760, %v3198_v34  ;;  %v3790_v10 = vand.u32 4294901760, %v2566_v55  ;;  %v3791_v12 = vand.u32 4294901760, %v2593_v26  ;;  %v3231_v30 = vsub.f32 %v51_v50, %v3200_v63 }
  0x63   :  { %v414_v23 = vsub.f32 %v3122_v61, %v3789_v11  ;;  %1989 = vmatprep.subr.bf16.mxu1 %v3671_v47  ;;  %2096 = vmatpush1.bf16.msra.mxu0 %v2095_v62  ;;  %v3233_v22 = vand.u32 4294901760, %v53_v20  ;;  %v3792_v36 = vand.u32 4294901760, %v3023_v8  ;;  %v409_v11 = vand.u32 4294901760, %v408_v3 }
  0x64   :  { %386 = vmatmul.mubr.f32.gmra.mrb[20].mxu1 %v385_v13  ;;  %v2098_v14 = vpack.c.bf16 %v3791_v12, %v3790_v10  ;;  %v423_v13 = vsub.f32 %v3129_v41, %v422_v52  ;;  %v437_v62 = vand.u32 4294901760, %v3209_v28  ;;  %v3240_v38 = vsub.f32 %v134_v56, %v3211_v40  ;;  %2097 = vmatprep.subr.bf16.mxu0 %v3671_v47 }
  0x65   :  { %1233 = vmatmul.mubr.f32.gmra.mrb[20].mxu0 %v3792_v36  ;;  %395 = vmatprep.mubr.f32.mxu1 %v394_v24  ;;  %v3793_v48 = vand.u32 4294901760, %v3037_v53  ;;  %v1993_v50 = vpack.c.bf16 %v632_v32, %v625_v49  ;;  %v638_v10 = vsub.f32 %v3788_v4, %v637_v5  ;;  %v415_v12 = vand.u32 4294901760, %v414_v23 }
  0x66   :  { %1991 = vmatpush1.bf16.msra.mxu1 %v1990_v29  ;;  %v429_v24 = vsub.f32 %v3198_v34, %v428_v6  ;;  %v443_v3 = vand.u32 4294901760, %v3231_v30  ;;  %v3794_v56 = vand.u32 4294901760, %v3758_v45  ;;  %v3795_v36 = vand.u32 4294901760, %v3761_v42 }
  0x67   :  { %1240 = vmatprep.mubr.f32.mxu0 %v3793_v48  ;;  %1992 = vmatprep.subr.bf16.mxu1 %v3671_v47  ;;  %v3254_v29 = vsub.f32 %v53_v20, %v3233_v22  ;;  %v3796_v23 = vand.u32 4294901760, %v3068_v43  ;;  %v424_v49 = vand.u32 4294901760, %v423_v13  ;;  %v452_v32 = vand.u32 4294901760, %v3240_v38 }
  0x68   :  { %401 = vmatmul.mubr.f32.gmra.mrb[22].mxu1 %v400_v1  ;;  %2099 = vmatpush1.bf16.msra.mxu0 %v2098_v14  ;;  %v2101_v48 = vpack.c.bf16 %v3795_v36, %v3794_v56  ;;  %v438_v1 = vsub.f32 %v3209_v28, %v437_v62  ;;  %v3797_v14 = vand.u32 4294901760, %v3077_v25  ;;  %v639_v34 = vand.u32 4294901760, %v638_v10 }
  0x69   :  { %1244 = vmatmul.mubr.f32.gmra.mrb[22].mxu0 %v3796_v23  ;;  %410 = vmatprep.mubr.f32.mxu1 %v409_v11  ;;  %v3798_v56 = vmov 0.0   ;;  %v430_v20 = vand.u32 4294901760, %v429_v24  ;;  %v444_v36 = vsub.f32 %v3231_v30, %v443_v3  ;;  %v458_v11 = vand.u32 4294901760, %v3254_v29 }
  0x6a   :  { %1251 = vmatprep.mubr.f32.mxu0 %v3797_v14  ;;  %1994 = vmatpush1.bf16.msra.mxu1 %v1993_v50  ;;  %v3799_v13 = vand.u32 4294901760, %v3122_v61  ;;  %v439_v23 = vand.u32 4294901760, %v438_v1  ;;  %v453_v14 = vsub.f32 %v3240_v38, %v452_v32  ;;  %v3807_v1 = vpack.c.bf16 %v3765_v46, %v3764_v18  ;;  %v3813_v46 = vld [vmem:[#allocation8_spill] sm:$0xff] }
  0x6b   :  { %2100 = vmatprep.subr.bf16.mxu0 %v3671_v47  ;;  %634 = vmatprep.subr.mxu1 %v3798_v56  ;;  %v445_v50 = vand.u32 4294901760, %v444_v36  ;;  %v459_v10 = vsub.f32 %v3254_v29, %v458_v11  ;;  %v3810_v36 = vld [vmem:[#allocation37_spill] sm:$0xff]  ;;  %v3812_v18 = vpack.c.bf16 %v3770_v60, %v3769_v21  ;;  %v3816_v21 = vpack.c.bf16 %v3772_v9, %v3771_v17  ;;  %v3821_v17 = vld [vmem:[#allocation11_spill] sm:$0xff]  ;;  %v3822_v9 = vld [vmem:[#allocation52_spill] sm:$0xff] }
  0x6c   :  { %416 = vmatmul.mubr.f32.gmra.mrb[24].mxu1 %v415_v12  ;;  %2102 = vmatpush1.bf16.msra.mxu0 %v2101_v48  ;;  %v454_v12 = vand.u32 4294901760, %v453_v14  ;;  %v3802_v48 = vld [vmem:[#allocation13_spill] sm:$0xff]  ;;  %v3818_v14 = vld [vmem:[#allocation46_spill] sm:$0xff] }
  0x6d   :  { %1255 = vmatmul.mubr.f32.gmra.mrb[24].mxu0 %v3799_v13  ;;  %425 = vmatprep.mubr.f32.mxu1 %v424_v49  ;;  %v460_v24 = vand.u32 4294901760, %v459_v10  ;;  %v3814_v13 = vld [vmem:[#allocation42_spill] sm:$0xff]  ;;  %v3817_v60 = vld [vmem:[#allocation9_spill] sm:$0xff]  ;;  %v3820_v10 = vpack.c.bf16 %v2485_v59, %v2472_v51  ;;  %v3826_v59 = vld [vmem:[#allocation55_spill] sm:$0xff] }
  0x6e   :  { %1262 = vmatprep.mubr.f32.mxu0 %v422_v52  ;;  %640 = vmatpush1.msra.mxu1 %v639_v34  ;;  %v3800_v34 = vld [vmem:[#allocation12_spill] sm:$0xff]  ;;  %v3801_v52 = vld [vmem:[#allocation10_spill] sm:$0xff]  ;;  %v3825_v51 = vld [vmem:[#allocation21_spill] sm:$0xff] }
  0x6f   :  { %1413 = vmatprep.subr.mxu0 %v3798_v56  ;;  %1995 = vmatprep.subr.bf16.mxu1 %v3671_v47  ;;  %v1996_v49 = vpack.c.bf16 %v3802_v48, %v3801_v52  ;;  %v3827_v52 = vld [vmem:[#allocation57_spill] sm:$0xff]  ;;  %v3828_v48 = vpack.c.bf16 %v2506_v7, %v2498_v2  ;;  %v3834_v7 = vpack.c.bf16 %v2544_v33, %v2541_v27 }
  0x70   :  { %431 = vmatmul.mubr.f32.gmra.mrb[26].mxu1 %v430_v20  ;;  %1417 = vmatpush1.msra.mxu0 %v637_v5  ;;  %v3803_v5 = vld [vmem:[#allocation22_spill] sm:$0xff]  ;;  %v3809_v20 = vld [vmem:[#allocation7_spill] sm:$0xff]  ;;  %v3833_v2 = vld [vmem:[#allocation25_spill] sm:$0xff] }
  0x71   :  { %1266 = vmatmul.mubr.f32.gmra.mrb[26].mxu0 %v428_v6  ;;  %440 = vmatprep.mubr.f32.mxu1 %v439_v23  ;;  %v3804_v6 = vld [vmem:[#allocation30_spill] sm:$0xff]  ;;  %v3815_v23 = vld [vmem:[#allocation45_spill] sm:$0xff] }
  0x72   :  { %1273 = vmatprep.mubr.f32.mxu0 %v437_v62  ;;  %2103 = vmatprep.subr.bf16.mxu0 %v3671_v47  ;;  %v3805_v62 = vld [vmem:[#allocation6_spill] sm:$0xff]  ;;  %v3837_v27 = vld [vmem:[#allocation29_spill] sm:$0xff] }
  0x73   :  { %v3838_v33 = vld [vmem:[#allocation69_spill] sm:$0xff] }
  0x74   :  { %446 = vmatmul.mubr.f32.gmra.mrb[28].mxu1 %v445_v50  ;;  %v3819_v50 = vld [vmem:[#allocation51_spill] sm:$0xff] }
  0x75   :  { %1277 = vmatmul.mubr.f32.gmra.mrb[28].mxu0 %v443_v3  ;;  %455 = vmatprep.mubr.f32.mxu1 %v454_v12  ;;  %v3806_v3 = vld [vmem:[#allocation28_spill] sm:$0xff]  ;;  %v3823_v12 = vld [vmem:[#allocation54_spill] sm:$0xff] }
  0x76   :  { %1284 = vmatprep.mubr.f32.mxu0 %v452_v32  ;;  %v3808_v32 = vld [vmem:[#allocation35_spill] sm:$0xff] }
  0x78   :  { %461 = vmatmul.mubr.f32.gmra.mrb[30].mxu1 %v460_v24  ;;  %v3824_v24 = vpack.c.bf16 %v3775_v58, %v2494_v0  ;;  %v3829_v0 = vld [vmem:[#allocation24_spill] sm:$0xff] }
  0x79   :  { %1288 = vmatmul.mubr.f32.gmra.mrb[30].mxu0 %v458_v11  ;;  %656 = vmatprep.mubr.f32.mxu1 %v3800_v34  ;;  %v3811_v11 = vld [vmem:[#allocation40_spill] sm:$0xff] }
  0x7a   :  { %1433 = vmatprep.mubr.f32.mxu0 %v3800_v34  ;;  %v3830_v58 = vld [vmem:[#allocation60_spill] sm:$0xff] }
  0x7c   :  { %658 = vmatmul.mubr.f32.vlgmr.msra.gmra.mrb[0].mxu1 %v3803_v5 }
  0x7d   :  { %1435 = vmatmul.mubr.f32.vlgmr.msra.gmra.mrb[0].mxu0 %v3803_v5  ;;  %1997 = vmatpush1.bf16.msra.mxu1 %v1996_v49  ;;  %v3831_v49 = vld [vmem:[#allocation63_spill] sm:$0xff] }
  0x7e   :  { %663 = vmatprep.mubr.f32.mxu1 %v3804_v6  ;;  %1440 = vmatprep.mubr.f32.mxu0 %v3804_v6 }
  0x7f   :  { %2105 = vmatpush1.bf16.msra.mxu0 %v3805_v62  ;;  %1998 = vmatprep.subr.bf16.mxu1 %v3671_v47  ;;  %v3832_v62 = vpack.c.bf16 %v2523_v19, %v2518_v15  ;;  %v3835_v15 = vld [vmem:[#allocation26_spill] sm:$0xff]  ;;  %v3836_v19 = vpack.c.bf16 %v2564_v54, %v2556_v44  ;;  %v3840_v44 = vld [vmem:[#allocation32_spill] sm:$0xff] }
  0x80   :  { %665 = vmatmul.mubr.f32.gmra.mrb[2].mxu1 %v3806_v3  ;;  %2106 = vmatprep.subr.bf16.mxu0 %v3671_v47  ;;  %v3841_v54 = vld [vmem:[#allocation70_spill] sm:$0xff] }
  0x81   :  { %1442 = vmatmul.mubr.f32.gmra.mrb[2].mxu0 %v3806_v3  ;;  %2000 = vmatpush1.bf16.msra.mxu1 %v3807_v1  ;;  %v3839_v1 = vpack.c.bf16 %v2593_v26, %v2566_v55  ;;  %v3843_v55 = vld [vmem:[#allocation36_spill] sm:$0xff]  ;;  %v3844_v26 = vld [vmem:[#allocation71_spill] sm:$0xff] }
  0x82   :  { %670 = vmatprep.mubr.f32.mxu1 %v3808_v32  ;;  %1447 = vmatprep.mubr.f32.mxu0 %v3808_v32 }
  0x83   :  { %2108 = vmatpush1.bf16.msra.mxu0 %v3809_v20  ;;  %2001 = vmatprep.subr.bf16.mxu1 %v3671_v47  ;;  %v3842_v20 = vpack.c.bf16 %v3761_v42, %v3758_v45  ;;  %v3847_v45 = vld [vmem:[#allocation38_spill] sm:$0xff]  ;;  %v3848_v42 = vld [vmem:[#allocation39_spill] sm:$0xff] }
  0x84   :  { %672 = vmatmul.mubr.f32.gmra.mrb[4].mxu1 %v3810_v36  ;;  %2109 = vmatprep.subr.bf16.mxu0 %v3671_v47 }
  0x85   :  { %1449 = vmatmul.mubr.f32.gmra.mrb[4].mxu0 %v3810_v36  ;;  %677 = vmatprep.mubr.f32.mxu1 %v3811_v11 }
  0x86   :  { %2003 = vmatpush1.bf16.msra.mxu1 %v3812_v18  ;;  %1454 = vmatprep.mubr.f32.mxu0 %v3811_v11  ;;  %v3846_v18 = vld [vmem:[#allocation33_spill] sm:$0xff] }
  0x87   :  { %2111 = vmatpush1.bf16.msra.mxu0 %v3813_v46  ;;  %2004 = vmatprep.subr.bf16.mxu1 %v3671_v47  ;;  %v3851_v46 = vld [vmem:[#allocation34_spill] sm:$0xff] }
  0x88   :  { %679 = vmatmul.mubr.f32.gmra.mrb[6].mxu1 %v3814_v13  ;;  %2112 = vmatprep.subr.bf16.mxu0 %v3671_v47 }
  0x89   :  { %1456 = vmatmul.mubr.f32.gmra.mrb[6].mxu0 %v3814_v13  ;;  %684 = vmatprep.mubr.f32.mxu1 %v3815_v23 }
  0x8a   :  { %1461 = vmatprep.mubr.f32.mxu0 %v3815_v23  ;;  %2006 = vmatpush1.bf16.msra.mxu1 %v3816_v21  ;;  %v3852_v21 = vld [vmem:[#allocation31_spill] sm:$0xff] }
  0x8b   :  { %2114 = vmatpush1.bf16.msra.mxu0 %v3817_v60  ;;  %2007 = vmatprep.subr.bf16.mxu1 %v3671_v47  ;;  %v3853_v60 = vld [vmem:[#allocation41_spill] sm:$0xff] }
  0x8c   :  { %686 = vmatmul.mubr.f32.gmra.mrb[8].mxu1 %v3818_v14  ;;  %2115 = vmatprep.subr.bf16.mxu0 %v3671_v47 }
  0x8d   :  { %1463 = vmatmul.mubr.f32.gmra.mrb[8].mxu0 %v3818_v14  ;;  %691 = vmatprep.mubr.f32.mxu1 %v3819_v50 }
  0x8e   :  { %1468 = vmatprep.mubr.f32.mxu0 %v3819_v50  ;;  %2009 = vmatpush1.bf16.msra.mxu1 %v3820_v10  ;;  %v3854_v10 = vld [vmem:[#allocation44_spill] sm:$0xff] }
  0x8f   :  { %2117 = vmatpush1.bf16.msra.mxu0 %v3821_v17  ;;  %2010 = vmatprep.subr.bf16.mxu1 %v3671_v47  ;;  %v3866_v17 = vld [vmem:[#allocation65_spill] sm:$0xff] }
  0x90   :  { %693 = vmatmul.mubr.f32.gmra.mrb[10].mxu1 %v3822_v9  ;;  %2118 = vmatprep.subr.bf16.mxu0 %v3671_v47 }
  0x91   :  { %1470 = vmatmul.mubr.f32.gmra.mrb[10].mxu0 %v3822_v9  ;;  %698 = vmatprep.mubr.f32.mxu1 %v3823_v12 }
  0x92   :  { %1475 = vmatprep.mubr.f32.mxu0 %v3823_v12  ;;  %2012 = vmatpush1.bf16.msra.mxu1 %v3824_v24  ;;  %v3869_v24 = vld [vmem:[#allocation68_spill] sm:$0xff] }
  0x93   :  { %2120 = vmatpush1.bf16.msra.mxu0 %v3825_v51  ;;  %2013 = vmatprep.subr.bf16.mxu1 %v3671_v47 }
  0x94   :  { %700 = vmatmul.mubr.f32.gmra.mrb[12].mxu1 %v3826_v59  ;;  %2121 = vmatprep.subr.bf16.mxu0 %v3671_v47 }
  0x95   :  { %1477 = vmatmul.mubr.f32.gmra.mrb[12].mxu0 %v3826_v59  ;;  %705 = vmatprep.mubr.f32.mxu1 %v3827_v52 }
  0x96   :  { %1482 = vmatprep.mubr.f32.mxu0 %v3827_v52  ;;  %2015 = vmatpush1.bf16.msra.mxu1 %v3828_v48 }
  0x97   :  { %2123 = vmatpush1.bf16.msra.mxu0 %v3829_v0  ;;  %2016 = vmatprep.subr.bf16.mxu1 %v3671_v47 }
  0x98   :  { %707 = vmatmul.mubr.f32.gmra.mrb[14].mxu1 %v3830_v58  ;;  %2124 = vmatprep.subr.bf16.mxu0 %v3671_v47 }
  0x99   :  { %1484 = vmatmul.mubr.f32.gmra.mrb[14].mxu0 %v3830_v58  ;;  %712 = vmatprep.mubr.f32.mxu1 %v3831_v49 }
  0x9a   :  { %1489 = vmatprep.mubr.f32.mxu0 %v3831_v49  ;;  %2018 = vmatpush1.bf16.msra.mxu1 %v3832_v62 }
  0x9b   :  { %2126 = vmatpush1.bf16.msra.mxu0 %v3833_v2  ;;  %2019 = vmatprep.subr.bf16.mxu1 %v3671_v47 }
  0x9c   :  { %714 = vmatmul.mubr.f32.gmra.mrb[16].mxu1 %v2852_v57  ;;  %2127 = vmatprep.subr.bf16.mxu0 %v3671_v47 }
  0x9d   :  { %1491 = vmatmul.mubr.f32.gmra.mrb[16].mxu0 %v2852_v57  ;;  %719 = vmatprep.mubr.f32.mxu1 %v2859_v39 }
  0x9e   :  { %1496 = vmatprep.mubr.f32.mxu0 %v2859_v39  ;;  %2021 = vmatpush1.bf16.msra.mxu1 %v3834_v7 }
  0x9f   :  { %2129 = vmatpush1.bf16.msra.mxu0 %v3835_v15  ;;  %2022 = vmatprep.subr.bf16.mxu1 %v3671_v47 }
  0xa0   :  { %721 = vmatmul.mubr.f32.gmra.mrb[18].mxu1 %v2875_v37  ;;  %2130 = vmatprep.subr.bf16.mxu0 %v3671_v47 }
  0xa1   :  { %1498 = vmatmul.mubr.f32.gmra.mrb[18].mxu0 %v2875_v37  ;;  %726 = vmatprep.mubr.f32.mxu1 %v2934_v35 }
  0xa2   :  { %1503 = vmatprep.mubr.f32.mxu0 %v2934_v35  ;;  %2024 = vmatpush1.bf16.msra.mxu1 %v3836_v19 }
  0xa3   :  { %2132 = vmatpush1.bf16.msra.mxu0 %v3837_v27  ;;  %2025 = vmatprep.subr.bf16.mxu1 %v3671_v47 }
  0xa4   :  { %728 = vmatmul.mubr.f32.gmra.mrb[20].mxu1 %v2975_v31  ;;  %2133 = vmatprep.subr.bf16.mxu0 %v3671_v47 }
  0xa5   :  { %1505 = vmatmul.mubr.f32.gmra.mrb[20].mxu0 %v2975_v31  ;;  %733 = vmatprep.mubr.f32.mxu1 %v3838_v33 }
  0xa6   :  { %1510 = vmatprep.mubr.f32.mxu0 %v3838_v33  ;;  %2027 = vmatpush1.bf16.msra.mxu1 %v3839_v1 }
  0xa7   :  { %2135 = vmatpush1.bf16.msra.mxu0 %v3840_v44  ;;  %2028 = vmatprep.subr.bf16.mxu1 %v3671_v47 }
  0xa8   :  { %735 = vmatmul.mubr.f32.gmra.mrb[22].mxu1 %v3029_v16  ;;  %2136 = vmatprep.subr.bf16.mxu0 %v3671_v47  ;;  %v3845_v47 = vld [vmem:[#allocation72_spill] sm:$0xff] }
  0xa9   :  { %1512 = vmatmul.mubr.f32.gmra.mrb[22].mxu0 %v3029_v16  ;;  %740 = vmatprep.mubr.f32.mxu1 %v3841_v54 }
  0xaa   :  { %1517 = vmatprep.mubr.f32.mxu0 %v3841_v54  ;;  %2030 = vmatpush1.bf16.msra.mxu1 %v3842_v20 }
  0xab   :  { %2138 = vmatpush1.bf16.msra.mxu0 %v3843_v55  ;;  %864 = vmatprep.subr.mxu1 %v3798_v56 }
  0xac   :  { %742 = vmatmul.mubr.f32.gmra.mrb[24].mxu1 %v3844_v26  ;;  %1617 = vmatprep.subr.mxu0 %v3798_v56  ;;  %v3850_v56 = vld [vmem:[#allocation27_spill] sm:$0xff] }
  0xad   :  { %1519 = vmatmul.mubr.f32.gmra.mrb[24].mxu0 %v3844_v26  ;;  %747 = vmatprep.mubr.f32.mxu1 %v3845_v47 }
  0xae   :  { %1524 = vmatprep.mubr.f32.mxu0 %v3845_v47  ;;  %867 = vmatpush1.msra.mxu1 %v3788_v4  ;;  %v3849_v4 = vld [vmem:[#allocation18_spill] sm:$0xff] }
  0xaf   :  { %1619 = vmatpush1.msra.mxu0 %v3846_v18 }
  0xb0   :  { %749 = vmatmul.mubr.f32.gmra.mrb[26].mxu1 %v3847_v45 }
  0xb1   :  { %1526 = vmatmul.mubr.f32.gmra.mrb[26].mxu0 %v3847_v45  ;;  %754 = vmatprep.mubr.f32.mxu1 %v3848_v42 }
  0xb2   :  { %1531 = vmatprep.mubr.f32.mxu0 %v3848_v42 }
  0xb4   :  { %756 = vmatmul.mubr.f32.gmra.mrb[28].mxu1 %v3200_v63 }
  0xb5   :  { %1533 = vmatmul.mubr.f32.gmra.mrb[28].mxu0 %v3200_v63  ;;  %761 = vmatprep.mubr.f32.mxu1 %v3211_v40 }
  0xb6   :  { %1538 = vmatprep.mubr.f32.mxu0 %v3211_v40 }
  0xb8   :  { %763 = vmatmul.mubr.f32.gmra.mrb[30].mxu1 %v3233_v22 }
  0xb9   :  { %1540 = vmatmul.mubr.f32.gmra.mrb[30].mxu0 %v3233_v22  ;;  %884 = vmatprep.mubr.f32.mxu1 %v3849_v4 }
  0xba   :  { %1635 = vmatprep.mubr.f32.mxu0 %v3800_v34  ;;  %v3855_v34 = vld [vmem:[#allocation47_spill] sm:$0xff] }
  0xbc   :  { %887 = vmatmul.mubr.f32.vlgmr.msra.gmra.mrb[0].mxu1 %v3850_v56 }
  0xbd   :  { %1637 = vmatmul.mubr.f32.vlgmr.msra.gmra.mrb[0].mxu0 %v3803_v5  ;;  %893 = vmatprep.mubr.f32.mxu1 %v3851_v46  ;;  %v3856_v5 = vld [vmem:[#allocation48_spill] sm:$0xff] }
  0xbe   :  { %1642 = vmatprep.mubr.f32.mxu0 %v3804_v6  ;;  %v3857_v6 = vld [vmem:[#allocation49_spill] sm:$0xff] }
  0xc0   :  { %896 = vmatmul.mubr.f32.gmra.mrb[2].mxu1 %v3852_v21 }
  0xc1   :  { %1644 = vmatmul.mubr.f32.gmra.mrb[2].mxu0 %v3806_v3  ;;  %902 = vmatprep.mubr.f32.mxu1 %v3853_v60  ;;  %v3858_v3 = vld [vmem:[#allocation50_spill] sm:$0xff] }
  0xc2   :  { %1649 = vmatprep.mubr.f32.mxu0 %v3808_v32  ;;  %v3859_v32 = vld [vmem:[#allocation53_spill] sm:$0xff] }
  0xc4   :  { %905 = vmatmul.mubr.f32.gmra.mrb[4].mxu1 %v3854_v10 }
  0xc5   :  { %1651 = vmatmul.mubr.f32.gmra.mrb[4].mxu0 %v3810_v36  ;;  %911 = vmatprep.mubr.f32.mxu1 %v3855_v34  ;;  %v3860_v36 = vld [vmem:[#allocation56_spill] sm:$0xff] }
  0xc6   :  { %1656 = vmatprep.mubr.f32.mxu0 %v3811_v11  ;;  %v3861_v11 = vld [vmem:[#allocation58_spill] sm:$0xff] }
  0xc8   :  { %914 = vmatmul.mubr.f32.gmra.mrb[6].mxu1 %v3856_v5 }
  0xc9   :  { %1658 = vmatmul.mubr.f32.gmra.mrb[6].mxu0 %v3814_v13  ;;  %920 = vmatprep.mubr.f32.mxu1 %v3857_v6  ;;  %v3862_v13 = vld [vmem:[#allocation59_spill] sm:$0xff] }
  0xca   :  { %1663 = vmatprep.mubr.f32.mxu0 %v3815_v23  ;;  %v3863_v23 = vld [vmem:[#allocation61_spill] sm:$0xff] }
  0xcc   :  { %923 = vmatmul.mubr.f32.gmra.mrb[8].mxu1 %v3858_v3 }
  0xcd   :  { %1665 = vmatmul.mubr.f32.gmra.mrb[8].mxu0 %v3818_v14  ;;  %929 = vmatprep.mubr.f32.mxu1 %v3859_v32  ;;  %v3864_v14 = vld [vmem:[#allocation62_spill] sm:$0xff] }
  0xce   :  { %1670 = vmatprep.mubr.f32.mxu0 %v3819_v50  ;;  %v3865_v50 = vld [vmem:[#allocation64_spill] sm:$0xff] }
  0xd0   :  { %932 = vmatmul.mubr.f32.gmra.mrb[10].mxu1 %v3860_v36 }
  0xd1   :  { %1672 = vmatmul.mubr.f32.gmra.mrb[10].mxu0 %v3822_v9  ;;  %938 = vmatprep.mubr.f32.mxu1 %v3861_v11  ;;  %v3867_v9 = vld [vmem:[#allocation66_spill] sm:$0xff] }
  0xd2   :  { %1677 = vmatprep.mubr.f32.mxu0 %v3823_v12  ;;  %v3868_v12 = vld [vmem:[#allocation67_spill] sm:$0xff] }
  0xd4   :  { %941 = vmatmul.mubr.f32.gmra.mrb[12].mxu1 %v3862_v13 }
  0xd5   :  { %1679 = vmatmul.mubr.f32.gmra.mrb[12].mxu0 %v3826_v59  ;;  %947 = vmatprep.mubr.f32.mxu1 %v3863_v23 }
  0xd6   :  { %1684 = vmatprep.mubr.f32.mxu0 %v3827_v52 }
  0xd8   :  { %950 = vmatmul.mubr.f32.gmra.mrb[14].mxu1 %v3864_v14 }
  0xd9   :  { %1686 = vmatmul.mubr.f32.gmra.mrb[14].mxu0 %v3830_v58  ;;  %956 = vmatprep.mubr.f32.mxu1 %v3865_v50 }
  0xda   :  { %1691 = vmatprep.mubr.f32.mxu0 %v3831_v49 }
  0xdc   :  { %959 = vmatmul.mubr.f32.gmra.mrb[16].mxu1 %v3866_v17 }
  0xdd   :  { %1693 = vmatmul.mubr.f32.gmra.mrb[16].mxu0 %v2852_v57  ;;  %965 = vmatprep.mubr.f32.mxu1 %v3867_v9 }
  0xde   :  { %1698 = vmatprep.mubr.f32.mxu0 %v2859_v39 }
  0xe0   :  { %968 = vmatmul.mubr.f32.gmra.mrb[18].mxu1 %v3868_v12 }
  0xe1   :  { %1700 = vmatmul.mubr.f32.gmra.mrb[18].mxu0 %v2875_v37  ;;  %974 = vmatprep.mubr.f32.mxu1 %v3869_v24  ;;  %v3870_v37 = vld [vmem:[#allocation14_spill] sm:$0xff] }
  0xe2   :  { %1705 = vmatprep.mubr.f32.mxu0 %v2934_v35 }
  0xe4   :  { %977 = vmatmul.mubr.f32.gmra.mrb[20].mxu1 %v3023_v8 }
  0xe5   :  { %1707 = vmatmul.mubr.f32.gmra.mrb[20].mxu0 %v2975_v31  ;;  %983 = vmatprep.mubr.f32.mxu1 %v3037_v53 }
  0xe6   :  { %1712 = vmatprep.mubr.f32.mxu0 %v3838_v33 }
  0xe8   :  { %986 = vmatmul.mubr.f32.gmra.mrb[22].mxu1 %v3068_v43  ;;  %v3477_v43 = vld [vmem:[%s3530_s2] ss:$0 sm:$0xff]  ;;  %s2328_s2 = smov [#allocation3]  }
  0xe9   :  { %1714 = vmatmul.mubr.f32.gmra.mrb[22].mxu0 %v3029_v16  ;;  %992 = vmatprep.mubr.f32.mxu1 %v3077_v25 }
  0xea   :  { %1719 = vmatprep.mubr.f32.mxu0 %v3841_v54 }
  0xec   :  { %995 = vmatmul.mubr.f32.gmra.mrb[24].mxu1 %v3122_v61 }
  0xed   :  { %1721 = vmatmul.mubr.f32.gmra.mrb[24].mxu0 %v3844_v26  ;;  %1001 = vmatprep.mubr.f32.mxu1 %v3129_v41 }
  0xee   :  { %1726 = vmatprep.mubr.f32.mxu0 %v3845_v47 }
  0xf0   :  { %1004 = vmatmul.mubr.f32.gmra.mrb[26].mxu1 %v3870_v37 }
  0xf1   :  { %1728 = vmatmul.mubr.f32.gmra.mrb[26].mxu0 %v3847_v45  ;;  %1010 = vmatprep.mubr.f32.mxu1 %v3209_v28 }
  0xf2   :  { %1733 = vmatprep.mubr.f32.mxu0 %v3848_v42 }
  0xf4   :  { %1013 = vmatmul.mubr.f32.gmra.mrb[28].mxu1 %v3231_v30 }
  0xf5   :  { %1735 = vmatmul.mubr.f32.gmra.mrb[28].mxu0 %v3200_v63  ;;  %1019 = vmatprep.mubr.f32.mxu1 %v3240_v38  ;;  %v3483_v38 = vld [vmem:[%s3531_s3] ss:$0 sm:$0xff]  ;;  %s1912_s3 = sshll.u32 %s2328_s2, 4  ;;  %s1913_s3 = int_to_ptr.vmem [resolvable:$true] %s1912_s3 }
  0xf6   :  { %1740 = vmatprep.mubr.f32.mxu0 %v3211_v40  ;;  %s2302_s29 = scalar_lea.vmem %s1913_s3, 16  ;;  %s2306_s30 = scalar_lea.vmem %s1913_s3, 32 }
  0xf7   :  { %p2303_p0 = scmp.ne.s32.totalorder %s1913_s3, %s2302_s29  ;;  %p2307_p1 = scmp.lt.s32.totalorder %s1913_s3, %s1913_s3 }
  0xf8   :  { %1022 = vmatmul.mubr.f32.gmra.mrb[30].mxu1 %v3254_v29  ;;  %p2308_p2 = scmp.lt.s32.totalorder %s2306_s30, %s2302_s29 }
  0xf9   :  { %1742 = vmatmul.mubr.f32.gmra.mrb[30].mxu0 %v3233_v22 }
  0xfa   :  { %p2309_p3 = por %p2308_p2, %p2307_p1 }
  0xfc   :  { %p2310_p4 = pnand %p2309_p3, %p2303_p0 }
 0x18f   :  { %v888_v57 = vpop.f32.mrb[0].mxu1 }
 0x190   :  { %v2139_v39 = vadd.f32 %v3477_v43, %v888_v57  ;;  %v1638_v35 = vpop.f32.mrb[0].mxu0  ;;  %v890_v31 = vpop.f32.mrb[1].mxu1 }
 0x191   :  { %v1640_v16 = vpop.f32.mrb[1].mxu0 }
 0x192   :  { %v2140_v63 = vadd.f32 %v2139_v39, %v1638_v35 }
 0x193   :  { %v897_v8 = vpop.f32.mrb[2].mxu1 }
 0x194   :  { %v1763_v53 = vmul.f32 0.01, %v2140_v63  ;;  %v2141_v25 = vadd.f32 %v3477_v43, %v897_v8  ;;  %v1645_v61 = vpop.f32.mrb[2].mxu0  ;;  %v899_v41 = vpop.f32.mrb[3].mxu1  ;;  %vm1747_vm1 = vcmp.gt.f32.partialorder %v2140_v63, 0.0 }
 0x195   :  { %v1647_v40 = vpop.f32.mrb[3].mxu0 }
 0x196   :  { %v2142_v28 = vadd.f32 %v2141_v25, %v1645_v61  ;;  %v1779_v30 = vsel %vm1747_vm1, %v2140_v63, %v1763_v53 }
 0x197   :  { %v906_v22 = vpop.f32.mrb[4].mxu1  ;;  %v1802_v29 = vmul.f32 %v3483_v38, %v1779_v30 }
 0x198   :  { %v1764_v51 = vmul.f32 0.01, %v2142_v28  ;;  %v2143_v59 = vadd.f32 %v3477_v43, %v906_v22  ;;  %v1652_v52 = vpop.f32.mrb[4].mxu0  ;;  %v908_v48 = vpop.f32.mrb[5].mxu1  ;;  %vm1748_vm2 = vcmp.gt.f32.partialorder %v2142_v28, 0.0 }
 0x199   :  { %v1654_v0 = vpop.f32.mrb[5].mxu0  ;;  %1818 = vadd.xlane.f32.xlu0 %v1802_v29 }
 0x19a   :  { %v2144_v58 = vadd.f32 %v2143_v59, %v1652_v52  ;;  %v1780_v49 = vsel %vm1748_vm2, %v2142_v28, %v1764_v51 }
 0x19b   :  { %v915_v62 = vpop.f32.mrb[6].mxu1  ;;  %v1803_v2 = vmul.f32 %v3483_v38, %v1780_v49 }
 0x19c   :  { %v1765_v7 = vmul.f32 0.01, %v2144_v58  ;;  %v2145_v15 = vadd.f32 %v3477_v43, %v915_v62  ;;  %v1659_v19 = vpop.f32.mrb[6].mxu0  ;;  %v917_v27 = vpop.f32.mrb[7].mxu1  ;;  %vm1749_vm3 = vcmp.gt.f32.partialorder %v2144_v58, 0.0 }
 0x19d   :  { %v1661_v33 = vpop.f32.mrb[7].mxu0  ;;  %1820 = vadd.xlane.f32.xlu0 %v1803_v2 }
 0x19e   :  { %v2146_v1 = vadd.f32 %v2145_v15, %v1659_v19  ;;  %v1781_v44 = vsel %vm1749_vm3, %v2144_v58, %v1765_v7 }
 0x19f   :  { %v924_v54 = vpop.f32.mrb[8].mxu1  ;;  %v1804_v20 = vmul.f32 %v3483_v38, %v1781_v44 }
 0x1a0   :  { %v1766_v55 = vmul.f32 0.01, %v2146_v1  ;;  %v2147_v26 = vadd.f32 %v3477_v43, %v924_v54  ;;  %v1666_v47 = vpop.f32.mrb[8].mxu0  ;;  %v926_v18 = vpop.f32.mrb[9].mxu1  ;;  %vm1750_vm4 = vcmp.gt.f32.partialorder %v2146_v1, 0.0 }
 0x1a1   :  { %v1668_v45 = vpop.f32.mrb[9].mxu0  ;;  %1822 = vadd.xlane.f32.xlu1 %v1804_v20 }
 0x1a2   :  { %v2148_v42 = vadd.f32 %v2147_v26, %v1666_v47  ;;  %v1782_v4 = vsel %vm1750_vm4, %v2146_v1, %v1766_v55 }
 0x1a3   :  { %v933_v56 = vpop.f32.mrb[10].mxu1  ;;  %v1805_v46 = vmul.f32 %v3483_v38, %v1782_v4 }
 0x1a4   :  { %v1767_v21 = vmul.f32 0.01, %v2148_v42  ;;  %v2149_v60 = vadd.f32 %v3477_v43, %v933_v56  ;;  %v1673_v10 = vpop.f32.mrb[10].mxu0  ;;  %v935_v34 = vpop.f32.mrb[11].mxu1  ;;  %vm1751_vm5 = vcmp.gt.f32.partialorder %v2148_v42, 0.0 }
 0x1a5   :  { %v1675_v5 = vpop.f32.mrb[11].mxu0  ;;  %1824 = vadd.xlane.f32.xlu1 %v1805_v46 }
 0x1a6   :  { %v2150_v6 = vadd.f32 %v2149_v60, %v1673_v10  ;;  %v1783_v3 = vsel %vm1751_vm5, %v2148_v42, %v1767_v21 }
 0x1a7   :  { %v942_v32 = vpop.f32.mrb[12].mxu1  ;;  %v1806_v36 = vmul.f32 %v3483_v38, %v1783_v3 }
 0x1a8   :  { %v1768_v11 = vmul.f32 0.01, %v2150_v6  ;;  %v2151_v13 = vadd.f32 %v3477_v43, %v942_v32  ;;  %v1680_v23 = vpop.f32.mrb[12].mxu0  ;;  %v944_v14 = vpop.f32.mrb[13].mxu1  ;;  %vm1752_vm6 = vcmp.gt.f32.partialorder %v2150_v6, 0.0 }
 0x1a9   :  { %v1682_v50 = vpop.f32.mrb[13].mxu0  ;;  %1826 = vadd.xlane.f32.xlu0 %v1806_v36 }
 0x1aa   :  { %v2152_v17 = vadd.f32 %v2151_v13, %v1680_v23  ;;  %v1784_v9 = vsel %vm1752_vm6, %v2150_v6, %v1768_v11 }
 0x1ab   :  { %v951_v12 = vpop.f32.mrb[14].mxu1  ;;  %v1807_v24 = vmul.f32 %v3483_v38, %v1784_v9 }
 0x1ac   :  { %v1769_v37 = vmul.f32 0.01, %v2152_v17  ;;  %v2153_v57 = vadd.f32 %v3477_v43, %v951_v12  ;;  %v1687_v39 = vpop.f32.mrb[14].mxu0  ;;  %v953_v35 = vpop.f32.mrb[15].mxu1  ;;  %vm1753_vm7 = vcmp.gt.f32.partialorder %v2152_v17, 0.0 }
 0x1ad   :  { %v1689_v31 = vpop.f32.mrb[15].mxu0  ;;  %1828 = vadd.xlane.f32.xlu1 %v1807_v24 }
 0x1ae   :  { %v2154_v16 = vadd.f32 %v2153_v57, %v1687_v39  ;;  %v1785_v63 = vsel %vm1753_vm7, %v2152_v17, %v1769_v37 }
 0x1af   :  { %v960_v8 = vpop.f32.mrb[16].mxu1  ;;  %v1808_v53 = vmul.f32 %v3483_v38, %v1785_v63 }
 0x1b0   :  { %v1770_v25 = vmul.f32 0.01, %v2154_v16  ;;  %v2155_v61 = vadd.f32 %v3477_v43, %v960_v8  ;;  %v1694_v41 = vpop.f32.mrb[16].mxu0  ;;  %v962_v40 = vpop.f32.mrb[17].mxu1  ;;  %vm1754_vm8 = vcmp.gt.f32.partialorder %v2154_v16, 0.0 }
 0x1b1   :  { %v1696_v28 = vpop.f32.mrb[17].mxu0  ;;  %1830 = vadd.xlane.f32.xlu0 %v1808_v53 }
 0x1b2   :  { %v2156_v30 = vadd.f32 %v2155_v61, %v1694_v41  ;;  %v1786_v22 = vsel %vm1754_vm8, %v2154_v16, %v1770_v25 }
 0x1b3   :  { %v969_v29 = vpop.f32.mrb[18].mxu1  ;;  %v1809_v51 = vmul.f32 %v3483_v38, %v1786_v22 }
 0x1b4   :  { %v1771_v59 = vmul.f32 0.01, %v2156_v30  ;;  %v2157_v52 = vadd.f32 %v3477_v43, %v969_v29  ;;  %v1701_v48 = vpop.f32.mrb[18].mxu0  ;;  %v971_v0 = vpop.f32.mrb[19].mxu1  ;;  %vm1755_vm9 = vcmp.gt.f32.partialorder %v2156_v30, 0.0 }
 0x1b5   :  { %v1703_v58 = vpop.f32.mrb[19].mxu0  ;;  %1832 = vadd.xlane.f32.xlu1 %v1809_v51  ;;  %v1922_v0 = vld [vmem:[#allocation2] ss:$0 sm:$0xff] }
 0x1b6   :  { %v2158_v49 = vadd.f32 %v2157_v52, %v1701_v48  ;;  %v1787_v62 = vsel %vm1755_vm9, %v2156_v30, %v1771_v59 }
 0x1b7   :  { %v978_v2 = vpop.f32.mrb[20].mxu1  ;;  %v1810_v7 = vmul.f32 %v3483_v38, %v1787_v62 }
 0x1b8   :  { %v1772_v15 = vmul.f32 0.01, %v2158_v49  ;;  %v2159_v19 = vadd.f32 %v3477_v43, %v978_v2  ;;  %v1708_v27 = vpop.f32.mrb[20].mxu0  ;;  %v980_v33 = vpop.f32.mrb[21].mxu1  ;;  %vm1756_vm10 = vcmp.gt.f32.partialorder %v2158_v49, 0.0 }
 0x1b9   :  { %v1710_v1 = vpop.f32.mrb[21].mxu0  ;;  %1834 = vadd.xlane.f32.xlu0 %v1810_v7 }
 0x1ba   :  { %v2160_v44 = vadd.f32 %v2159_v19, %v1708_v27  ;;  %v1788_v54 = vsel %vm1756_vm10, %v2158_v49, %v1772_v15 }
 0x1bb   :  { %v987_v20 = vpop.f32.mrb[22].mxu1  ;;  %v1811_v55 = vmul.f32 %v3483_v38, %v1788_v54 }
 0x1bc   :  { %v1773_v26 = vmul.f32 0.01, %v2160_v44  ;;  %v2161_v47 = vadd.f32 %v3477_v43, %v987_v20  ;;  %v1715_v18 = vpop.f32.mrb[22].mxu0  ;;  %v989_v45 = vpop.f32.mrb[23].mxu1  ;;  %vm1757_vm11 = vcmp.gt.f32.partialorder %v2160_v44, 0.0 }
 0x1bd   :  { %v1717_v42 = vpop.f32.mrb[23].mxu0  ;;  %1836 = vadd.xlane.f32.xlu1 %v1811_v55 }
 0x1be   :  { %v2162_v4 = vadd.f32 %v2161_v47, %v1715_v18  ;;  %v1789_v56 = vsel %vm1757_vm11, %v2160_v44, %v1773_v26 }
 0x1bf   :  { %v996_v46 = vpop.f32.mrb[24].mxu1  ;;  %v1812_v21 = vmul.f32 %v3483_v38, %v1789_v56 }
 0x1c0   :  { %v1774_v60 = vmul.f32 0.01, %v2162_v4  ;;  %v2163_v10 = vadd.f32 %v3477_v43, %v996_v46  ;;  %v1722_v34 = vpop.f32.mrb[24].mxu0  ;;  %v998_v5 = vpop.f32.mrb[25].mxu1  ;;  %vm1758_vm12 = vcmp.gt.f32.partialorder %v2162_v4, 0.0 }
 0x1c1   :  { %v1724_v6 = vpop.f32.mrb[25].mxu0  ;;  %1838 = vadd.xlane.f32.xlu0 %v1812_v21 }
 0x1c2   :  { %v2164_v3 = vadd.f32 %v2163_v10, %v1722_v34  ;;  %v1790_v32 = vsel %vm1758_vm12, %v2162_v4, %v1774_v60 }
 0x1c3   :  { %v1005_v36 = vpop.f32.mrb[26].mxu1  ;;  %v1813_v11 = vmul.f32 %v3483_v38, %v1790_v32 }
 0x1c4   :  { %v1775_v13 = vmul.f32 0.01, %v2164_v3  ;;  %v2165_v23 = vadd.f32 %v3477_v43, %v1005_v36  ;;  %v1729_v14 = vpop.f32.mrb[26].mxu0  ;;  %v1007_v50 = vpop.f32.mrb[27].mxu1  ;;  %vm1759_vm13 = vcmp.gt.f32.partialorder %v2164_v3, 0.0 }
 0x1c5   :  { %v1731_v17 = vpop.f32.mrb[27].mxu0  ;;  %1840 = vadd.xlane.f32.xlu1 %v1813_v11 }
 0x1c6   :  { %v2166_v9 = vadd.f32 %v2165_v23, %v1729_v14  ;;  %v1791_v12 = vsel %vm1759_vm13, %v2164_v3, %v1775_v13 }
 0x1c7   :  { %v1014_v24 = vpop.f32.mrb[28].mxu1  ;;  %v1814_v37 = vmul.f32 %v3483_v38, %v1791_v12 }
 0x1c8   :  { %v1776_v57 = vmul.f32 0.01, %v2166_v9  ;;  %v2167_v39 = vadd.f32 %v3477_v43, %v1014_v24  ;;  %v1736_v35 = vpop.f32.mrb[28].mxu0  ;;  %v1016_v31 = vpop.f32.mrb[29].mxu1  ;;  %vm1760_vm14 = vcmp.gt.f32.partialorder %v2166_v9, 0.0 }
 0x1c9   :  { %v1738_v16 = vpop.f32.mrb[29].mxu0  ;;  %1842 = vadd.xlane.f32.xlu0 %v1814_v37 }
 0x1ca   :  { %v2168_v63 = vadd.f32 %v2167_v39, %v1736_v35  ;;  %v1792_v8 = vsel %vm1760_vm14, %v2166_v9, %v1776_v57 }
 0x1cb   :  { %v1023_v53 = vpop.f32.mrb[30].mxu1  ;;  %v1815_v25 = vmul.f32 %v3483_v38, %v1792_v8 }
 0x1cc   :  { %v1777_v61 = vmul.f32 0.01, %v2168_v63  ;;  %v2169_v41 = vadd.f32 %v3477_v43, %v1023_v53  ;;  %v1743_v40 = vpop.f32.mrb[30].mxu0  ;;  %v1025_v28 = vpop.f32.mrb[31].mxu1  ;;  %vm1761_vm15 = vcmp.gt.f32.partialorder %v2168_v63, 0.0 }
 0x1cd   :  { %v1745_v30 = vpop.f32.mrb[31].mxu0  ;;  %1844 = vadd.xlane.f32.xlu1 %v1815_v25 }
 0x1ce   :  { %v2170_v22 = vadd.f32 %v2169_v41, %v1743_v40  ;;  %v1793_v29 = vsel %vm1761_vm15, %v2168_v63, %v1777_v61 }
 0x1cf   :  { %v1816_v51 = vmul.f32 %v3483_v38, %v1793_v29 }
 0x1d0   :  { %v1778_v59 = vmul.f32 0.01, %v2170_v22  ;;  %vm1762_vm0 = vcmp.gt.f32.partialorder %v2170_v22, 0.0 }
 0x1d1   :  { %1846 = vadd.xlane.f32.xlu0 %v1816_v51 }
 0x1d2   :  { %v1794_v52 = vsel %vm1762_vm0, %v2170_v22, %v1778_v59 }
 0x1d3   :  { %v1817_v48 = vmul.f32 %v3483_v38, %v1794_v52 }
 0x1d5   :  { %1848 = vadd.xlane.f32.xlu1 %v1817_v48 }
 0x226   :  { %v1819_v58 = vpop.xlane.xlu0 %1818 }
 0x227   :  { %v1857_v49 = vadd.f32 %v1922_v0, %v1819_v58 }
 0x229   :  { %1873 = vxpose.xlu0.b32.start [1/16] (narrow) %v1857_v49, 8 }
 0x22a   :  { %v1821_v43 = vpop.xlane.xlu0 %1820 }
 0x22b   :  { %v1858_v62 = vadd.f32 %v1922_v0, %v1821_v43 }
 0x22d   :  { %1874 = vxpose.xlu0.b32.cont [2/16] (narrow) %v1858_v62, 8 }
 0x22e   :  { %v1823_v2 = vpop.xlane.xlu1 %1822 }
 0x22f   :  { %v1859_v7 = vadd.f32 %v1922_v0, %v1823_v2 }
 0x231   :  { %1875 = vxpose.xlu0.b32.cont [3/16] (narrow) %v1859_v7, 8 }
 0x232   :  { %v1825_v15 = vpop.xlane.xlu1 %1824 }
 0x233   :  { %v1860_v19 = vadd.f32 %v1922_v0, %v1825_v15 }
 0x235   :  { %1876 = vxpose.xlu0.b32.cont [4/16] (narrow) %v1860_v19, 8 }
 0x236   :  { %v1827_v27 = vpop.xlane.xlu0 %1826 }
 0x237   :  { %v1861_v33 = vadd.f32 %v1922_v0, %v1827_v27 }
 0x239   :  { %1877 = vxpose.xlu0.b32.cont [5/16] (narrow) %v1861_v33, 8 }
 0x23a   :  { %v1829_v1 = vpop.xlane.xlu1 %1828 }
 0x23b   :  { %v1862_v44 = vadd.f32 %v1922_v0, %v1829_v1 }
 0x23d   :  { %1878 = vxpose.xlu0.b32.cont [6/16] (narrow) %v1862_v44, 8 }
 0x23e   :  { %v1831_v38 = vpop.xlane.xlu0 %1830 }
 0x23f   :  { %v1863_v54 = vadd.f32 %v1922_v0, %v1831_v38 }
 0x241   :  { %1879 = vxpose.xlu0.b32.cont [7/16] (narrow) %v1863_v54, 8 }
 0x242   :  { %v1833_v20 = vpop.xlane.xlu1 %1832 }
 0x243   :  { %v1864_v55 = vadd.f32 %v1922_v0, %v1833_v20 }
 0x245   :  { %1880 = vxpose.xlu0.b32.cont [8/16] (narrow) %v1864_v55, 8 }
 0x246   :  { %v1835_v26 = vpop.xlane.xlu0 %1834 }
 0x247   :  { %v1865_v47 = vadd.f32 %v1922_v0, %v1835_v26 }
 0x249   :  { %1881 = vxpose.xlu0.b32.cont [9/16] (narrow) %v1865_v47, 8 }
 0x24a   :  { %v1837_v18 = vpop.xlane.xlu1 %1836 }
 0x24b   :  { %v1866_v45 = vadd.f32 %v1922_v0, %v1837_v18 }
 0x24d   :  { %1882 = vxpose.xlu0.b32.cont [10/16] (narrow) %v1866_v45, 8 }
 0x24e   :  { %v1839_v42 = vpop.xlane.xlu0 %1838 }
 0x24f   :  { %v1867_v4 = vadd.f32 %v1922_v0, %v1839_v42 }
 0x251   :  { %1883 = vxpose.xlu0.b32.cont [11/16] (narrow) %v1867_v4, 8 }
 0x252   :  { %v1841_v56 = vpop.xlane.xlu1 %1840 }
 0x253   :  { %v1868_v46 = vadd.f32 %v1922_v0, %v1841_v56 }
 0x255   :  { %1884 = vxpose.xlu0.b32.cont [12/16] (narrow) %v1868_v46, 8 }
 0x256   :  { %v1843_v21 = vpop.xlane.xlu0 %1842 }
 0x257   :  { %v1869_v60 = vadd.f32 %v1922_v0, %v1843_v21 }
 0x259   :  { %1885 = vxpose.xlu0.b32.cont [13/16] (narrow) %v1869_v60, 8 }
 0x25a   :  { %v1845_v10 = vpop.xlane.xlu1 %1844 }
 0x25b   :  { %v1870_v34 = vadd.f32 %v1922_v0, %v1845_v10 }
 0x25d   :  { %1886 = vxpose.xlu0.b32.cont [14/16] (narrow) %v1870_v34, 8 }
 0x25e   :  { %v1847_v5 = vpop.xlane.xlu0 %1846 }
 0x25f   :  { %v1871_v6 = vadd.f32 %v1922_v0, %v1847_v5 }
 0x261   :  { %1887 = vxpose.xlu0.b32.cont [15/16] (narrow) %v1871_v6, 8 }
 0x262   :  { %v1849_v3 = vpop.xlane.xlu1 %1848 }
 0x263   :  { %v1872_v32 = vadd.f32 %v1922_v0, %v1849_v3 }
 0x265   :  { %1888 = vxpose.xlu0.b32.end [16/16] (narrow) %v1872_v32, 8 }
 0x2a9   :  { %v1889_v36 = vpop.trf.xlu0 }
 0x2aa   :  { %1905 = vst [vmem:[#allocation3] sm:$0x1] %v1889_v36 }
 0x2ab   :  { %2313 = shalt.err (!%p2310_p4)
}
 0x2ac   :  { %s2314_s8 = scalar_lea.hbm %s3533_s5, 16 }
 0x2ad   :  { %p2315_p5 = scmp.ne.s32.totalorder %s3533_s5, %s2314_s8  ;;  %p2318_p6 = scmp.lt.u32.totalorder %s2314_s8, %s3533_s5 }
 0x2af   :  { %p2320_p7 = pnand %p2318_p6, %p2315_p5 }
 0x2b1   :  { %2323 = shalt.err (!%p2320_p7)
}
 0x2b2   :  { %1915 = dma.vmem_to_hbm [thread:$0]  %s1913_s3, 16, %s3533_s5, [#allocation4]  }
 0x2b3   :  { %2324 = dma.done.wait [#allocation4], 16  }
 0x2b4   :  { %2325 = vsyncadd [#allocation4], 4294967280 }
 0x2b5   :  { %1919 = vsyncpa [#allocation4], 1 }

</bundles_post_ra>
